<compile_context>
chip_gen: v7x
topology: tpu7x:2x2x1
jax: 0.10.0
libtpu: 0.0.40
codegen_flags: <defaults>
</compile_context>

<pallas_src>
import functools

import jax
import jax.numpy as jnp
from jax.experimental import pallas as pl
from jax.experimental.pallas import tpu as pltpu

LANE = 128
ROW_PAD = 256                       # row padding per (user / item) half
E_RESIDENT_BUDGET = 8 * 1024 * 1024  # bytes (x2 buffers) for the resident E block
VMEM_LIMIT = 32 * 1024 * 1024        # explicit scoped-VMEM request (needed on v5e)


def _round_up(x, m):
    return ((x + m - 1) // m) * m


def _pick_row_tile(m):
    """Largest tile in {1024,512,256,128} dividing m with >=2 row tiles (v7x TCs)."""
    for c in (1024, 512, 256, 128):
        if c <= m // 2 and m % c == 0:
            return c
    return m


def _pick_k_tile(k):
    for c in (2048, 1024, 512, 256, 128):
        if c <= k and k % c == 0:
            return c
    return k


# -----------------------------------------------------------------------------
# Pallas kernel: one NGCF propagation "half" (user rows or item rows)
# -----------------------------------------------------------------------------
def _ngcf_half_kernel(tk, e_resident,
                      L_ref, Ekb_ref, Ei_ref, w1_ref, w2_ref, bsum_ref,
                      enext_ref, enextb_ref, enorm_ref, acc_ref):
    k = pl.program_id(1)
    nk = pl.num_programs(1)

    if e_resident:
        # Full bf16 E block is VMEM-resident (constant index_map); slice the
        # current reduction window in-kernel.
        start = pl.multiple_of(k * tk, 128)
        ek = Ekb_ref[pl.ds(start, tk), :]
    else:
        ek = Ekb_ref[...]

    # (tm, tk) bf16 L tile  x  (tk, Dp) bf16 E rows  ->  f32 partial of L @ E.
    partial = jnp.dot(L_ref[...], ek, preferred_element_type=jnp.float32)

    @pl.when(k == 0)
    def _():
        acc_ref[...] = partial          # first k-step writes directly (no zero pass)

    @pl.when(k > 0)
    def _():
        acc_ref[...] += partial

    @pl.when(k == nk - 1)
    def _():
        LE = acc_ref[...]               # (tm, Dp) f32 tile of L @ E
        Ei = Ei_ref[...]                # (tm, Dp) f32 matching rows of E
        # Fused epilogue (exact algebra):
        #   (LE@W1+b1) + (E@W1+b1) + ((LE*E)@W2+b2) = (LE+E)@W1 + (LE*E)@W2 + (2b1+b2)
        # bf16 MXU matmuls with f32 accumulation.
        s = (LE + Ei).astype(jnp.bfloat16)
        p = (LE * Ei).astype(jnp.bfloat16)
        msg = (jnp.dot(s, w1_ref[...], preferred_element_type=jnp.float32)
               + jnp.dot(p, w2_ref[...], preferred_element_type=jnp.float32)
               + bsum_ref[...])

        # LeakyReLU(negative_slope=0.2)
        e_next = jnp.where(msg >= 0.0, msg, 0.2 * msg)
        # TODO(synk): mess_dropout / node_dropout are eval-mode identities here.

        # F.normalize(p=2, dim=1) via rsqrt (EUP).  Padded feature columns are
        # exactly zero, so the norm equals the norm over the real columns.
        sumsq = jnp.sum(e_next * e_next, axis=1, keepdims=True)
        e_norm = e_next * jax.lax.rsqrt(jnp.maximum(sumsq, 1e-24))

        enext_ref[...] = e_next                          # f32 (next-layer Ei)
        enextb_ref[...] = e_next.astype(jnp.bfloat16)    # bf16 (next-layer reduce op)
        enorm_ref[...] = e_norm


def ngcf_half(Lb, Ekb, Ei, W1b, W2b, bsum):
    """One NGCF half-layer on lane-padded operands.

    Lb:   (M, K)   bf16 bipartite Laplacian block (zero row/col padded)
    Ekb:  (K, Dp)  bf16 embeddings of the *other* node set (reduction operand)
    Ei:   (M, Dp)  f32 embeddings of *this* node set (epilogue operand)
    W1b:  (Dp, Dop) bf16, zero padded;  W2b likewise
    bsum: (1, Dop) f32  == 2*b1 + b2 (zero padded)
    Returns (E_next_f32, E_next_bf16, E_norm_f32), all (M, Dop).
    """
    M, K = Lb.shape
    Kd, Dp = Ekb.shape
    assert Kd == K and Ei.shape == (M, Dp)
    Dop = W1b.shape[1]

    tm = _pick_row_tile(M)
    tk = _pick_k_tile(K)
    # Keep the bf16 reduction operand VMEM-resident when it fits the budget
    # (counting 2x for double buffering); otherwise stream it per k-block.
    e_resident = (2 * K * Dp * 2) <= E_RESIDENT_BUDGET
    if e_resident:
        ekb_spec = pl.BlockSpec((K, Dp), lambda i, k: (0, 0))
    else:
        ekb_spec = pl.BlockSpec((tk, Dp), lambda i, k: (k, 0))

    kernel = functools.partial(_ngcf_half_kernel, tk, e_resident)

    out_shape = (jax.ShapeDtypeStruct((M, Dop), jnp.float32),
                 jax.ShapeDtypeStruct((M, Dop), jnp.bfloat16),
                 jax.ShapeDtypeStruct((M, Dop), jnp.float32))

    return pl.pallas_call(
        kernel,
        out_shape=out_shape,
        grid_spec=pltpu.PrefetchScalarGridSpec(
            num_scalar_prefetch=0,
            grid=(M // tm, K // tk),                         # (row tiles, reduction)
            in_specs=[
                pl.BlockSpec((tm, tk), lambda i, k: (i, k)),     # L block (bf16)
                ekb_spec,                                        # E reduce op (bf16)
                pl.BlockSpec((tm, Dp), lambda i, k: (i, 0)),     # E rows, epilogue (f32)
                pl.BlockSpec((Dp, Dop), lambda i, k: (0, 0)),    # W1 (bf16)
                pl.BlockSpec((Dp, Dop), lambda i, k: (0, 0)),    # W2 (bf16)
                pl.BlockSpec((1, Dop), lambda i, k: (0, 0)),     # 2*b1 + b2 (f32)
            ],
            out_specs=[
                pl.BlockSpec((tm, Dop), lambda i, k: (i, 0)),    # E_next f32
                pl.BlockSpec((tm, Dop), lambda i, k: (i, 0)),    # E_next bf16
                pl.BlockSpec((tm, Dop), lambda i, k: (i, 0)),    # E_norm f32
            ],
            scratch_shapes=[pltpu.VMEM((tm, Dp), jnp.float32)],
        ),
        compiler_params=pltpu.CompilerParams(
            dimension_semantics=("parallel", "arbitrary"),
            vmem_limit_bytes=VMEM_LIMIT),
    )(Lb, Ekb, Ei, W1b, W2b, bsum)


def ngcf_half_ref(Lb, Ekb, Ei, W1b, W2b, bsum):
    """Pure-JAX reference mirroring the kernel's precision choices."""
    LE = jnp.dot(Lb, Ekb, preferred_element_type=jnp.float32)
    s = (LE + Ei).astype(jnp.bfloat16)
    p = (LE * Ei).astype(jnp.bfloat16)
    msg = (jnp.dot(s, W1b, preferred_element_type=jnp.float32)
           + jnp.dot(p, W2b, preferred_element_type=jnp.float32)
           + bsum)
    e_next = jnp.where(msg >= 0.0, msg, 0.2 * msg)
    sumsq = jnp.sum(e_next * e_next, axis=1, keepdims=True)
    e_norm = e_next * jax.lax.rsqrt(jnp.maximum(sumsq, 1e-24))
    return e_next, e_norm


# -----------------------------------------------------------------------------
# NGCF model (parameters + forward glue in plain JAX, hot path in Pallas)
# -----------------------------------------------------------------------------
class NGCFPallas:
    def __init__(self, embed_size, layer_size, emb_ratio, lap_list, num_dict,
                 key):
        assert embed_size % 5 == 0, "feats concat must equal embed_size"
        self.n_user = num_dict["user"]
        self.n_item = num_dict["item"]
        self.emb_size = embed_size
        self.weight_size = list(layer_size)
        self.n_layer = len(self.weight_size)
        self.emb_ratio = emb_ratio

        self.Mu = _round_up(self.n_user, ROW_PAD)     # padded user rows
        self.Mi = _round_up(self.n_item, ROW_PAD)     # padded item rows
        self.D_pad = _round_up(embed_size, LANE)      # lane-dense feature dim

        # Split each dense Laplacian into its two structurally-nonzero bipartite
        # blocks, zero-pad to tile multiples, cast to bf16 once.  This halves HBM
        # bytes and MXU work of the mem-bound L @ E stream every forward.
        # TODO(synk): non-bipartite Laplacians (e.g. with self loops) would need
        # the full dense path; NGCF uses a pure bipartite normalized adjacency.
        self.lap_ui, self.lap_iu = [], []
        for L in lap_list:
            L = jnp.asarray(L, jnp.float32)
            uu = L[:self.n_user, :self.n_user]
            ii = L[self.n_user:, self.n_user:]
            assert float(jnp.max(jnp.abs(uu))) == 0.0, "user-user block must be zero"
            assert float(jnp.max(jnp.abs(ii))) == 0.0, "item-item block must be zero"
            Lui = jnp.zeros((self.Mu, self.Mi), jnp.float32)
            Lui = Lui.at[:self.n_user, :self.n_item].set(L[:self.n_user, self.n_user:])
            Liu = jnp.zeros((self.Mi, self.Mu), jnp.float32)
            Liu = Liu.at[:self.n_item, :self.n_user].set(L[self.n_user:, :self.n_user])
            self.lap_ui.append(Lui.astype(jnp.bfloat16))
            self.lap_iu.append(Liu.astype(jnp.bfloat16))

        sub = embed_size // 5
        ks = jax.random.split(key, 7 + 4 * self.n_layer)

        def kaiming_uniform(k, shape):
            fan_in = shape[-1]
            bound = (6.0 / fan_in) ** 0.5
            return jax.random.uniform(k, shape, jnp.float32, -bound, bound)

        self.user_emb = kaiming_uniform(ks[0], (self.n_user, embed_size))
        self.item_emb = kaiming_uniform(ks[1], (self.n_item, embed_size))
        self.age_emb = kaiming_uniform(ks[2], (num_dict["age"], sub))
        self.sex_emb = kaiming_uniform(ks[3], (num_dict["sex"], sub))
        self.month_emb = kaiming_uniform(ks[4], (num_dict["month"], sub))
        self.day_emb = kaiming_uniform(ks[5], (num_dict["day"], sub))
        self.dow_emb = kaiming_uniform(ks[6], (num_dict["dayofweek"], sub))

        sizes = [embed_size] + self.weight_size
        # Store lane-padded bf16 weights and the fused f32 bias 2*b1 + b2 so the
        # kernel needs no per-call re-padding or casting.
        self.W1b, self.W2b, self.bsum = [], [], []
        for i in range(self.n_layer):
            din, dout = sizes[i], sizes[i + 1]
            din_p, dout_p = _round_up(din, LANE), _round_up(dout, LANE)
            bound = 1.0 / (din ** 0.5)
            kw = ks[7 + 4 * i: 7 + 4 * (i + 1)]
            W1 = jax.random.uniform(kw[0], (din, dout), jnp.float32, -bound, bound)
            b1 = jax.random.uniform(kw[1], (dout,), jnp.float32, -bound, bound)
            W2 = jax.random.uniform(kw[2], (din, dout), jnp.float32, -bound, bound)
            b2 = jax.random.uniform(kw[3], (dout,), jnp.float32, -bound, bound)

            W1p = jnp.zeros((din_p, dout_p), jnp.float32).at[:din, :dout].set(W1)
            W2p = jnp.zeros((din_p, dout_p), jnp.float32).at[:din, :dout].set(W2)
            bs = jnp.zeros((1, dout_p), jnp.float32).at[0, :dout].set(2.0 * b1 + b2)
            self.W1b.append(W1p.astype(jnp.bfloat16))
            self.W2b.append(W2p.astype(jnp.bfloat16))
            self.bsum.append(bs)

    def forward(self, year, u_id, age, sex, month, day, dow, pos_item,
                neg_item, node_flag=False, check=False):
        # --- feature embedding gathers (glue) ---
        feats = jnp.concatenate(
            (jnp.take(self.age_emb, age, axis=0),
             jnp.take(self.sex_emb, sex, axis=0),
             jnp.take(self.month_emb, month, axis=0),
             jnp.take(self.day_emb, day, axis=0),
             jnp.take(self.dow_emb, dow, axis=0)), axis=1)

        # --- blend user embeddings with demographic features (in-place in torch) ---
        r = self.emb_ratio
        blended = self.user_emb[u_id] * (1.0 - r) + feats * r
        user_w = self.user_emb.at[u_id].set(blended)
        self.user_emb = user_w  # mimic .weight.data mutation

        # --- Laplacian selection by year (host-side int: no per-forward device sync) ---
        if isinstance(year, int):
            y0 = year
        else:
            y0 = int(jax.device_get(jnp.asarray(year).reshape(-1))[0])
        year_idx = y0 % len(self.lap_ui)
        Lui = self.lap_ui[year_idx]
        Liu = self.lap_iu[year_idx]
        # TODO(synk): sparse node_dropout (node_flag=True path) not implemented.
        assert not node_flag

        # Pad rows + feature lanes (exact: zero padding).  Padded rows of E may
        # hold LeakyReLU(bsum) after a layer, but the matching L columns are zero
        # so they never contaminate real rows, and outputs are sliced to [:n].
        E_user = jnp.zeros((self.Mu, self.D_pad), jnp.float32)
        E_user = E_user.at[:self.n_user, :self.emb_size].set(user_w)
        E_item = jnp.zeros((self.Mi, self.D_pad), jnp.float32)
        E_item = E_item.at[:self.n_item, :self.emb_size].set(self.item_emb)
        E_user_b = E_user.astype(jnp.bfloat16)   # only layer 0 casts in XLA
        E_item_b = E_item.astype(jnp.bfloat16)

        users_cat = [user_w]
        items_cat = [self.item_emb]
        for i in range(self.n_layer):
            dout = self.weight_size[i]
            W1b, W2b, bs = self.W1b[i], self.W2b[i], self.bsum[i]

            # Both halves consume the pre-layer embeddings (same semantics as
            # torch.mm(L, E) over the full node set).
            u_next, u_next_b, u_norm = ngcf_half(Lui, E_item_b, E_user, W1b, W2b, bs)
            i_next, i_next_b, i_norm = ngcf_half(Liu, E_user_b, E_item, W1b, W2b, bs)

            if check:
                ru_n, ru_m = ngcf_half_ref(Lui, E_item_b, E_user, W1b, W2b, bs)
                ri_n, ri_m = ngcf_half_ref(Liu, E_user_b, E_item, W1b, W2b, bs)
                assert jnp.allclose(u_next, ru_n, atol=2e-2, rtol=2e-2)
                assert jnp.allclose(u_norm, ru_m, atol=2e-2, rtol=2e-2)
                assert jnp.allclose(i_next, ri_n, atol=2e-2, rtol=2e-2)
                assert jnp.allclose(i_norm, ri_m, atol=2e-2, rtol=2e-2)

            E_user, E_user_b = u_next, u_next_b
            E_item, E_item_b = i_next, i_next_b
            users_cat.append(u_norm[:self.n_user, :dout])
            items_cat.append(i_norm[:self.n_item, :dout])

        all_users = jnp.concatenate(users_cat, axis=1)
        all_items = jnp.concatenate(items_cat, axis=1)

        u_embeddings = all_users[u_id, :]
        pos_i_embeddings = all_items[pos_item, :]
        if neg_item.shape[0] > 0:
            neg_i_embeddings = all_items[neg_item, :]
        else:
            neg_i_embeddings = jnp.zeros((0, all_users.shape[1]), jnp.float32)
        return u_embeddings, pos_i_embeddings, neg_i_embeddings


def make_normalized_laplacian(key, n_user, n_item):
    """Dense symmetric-normalized bipartite adjacency D^-1/2 A D^-1/2."""
    N = n_user + n_item
    adj = (jax.random.uniform(key, (n_user, n_item)) < 0.1).astype(jnp.float32)
    A = jnp.zeros((N, N), jnp.float32)
    A = A.at[:n_user, n_user:].set(adj)
    A = A.at[n_user:, :n_user].set(adj.T)
    deg = jnp.sum(A, axis=1)
    d_inv_sqrt = jnp.where(deg > 0, 1.0 / jnp.sqrt(jnp.maximum(deg, 1e-12)), 0.0)
    return A * d_inv_sqrt[:, None] * d_inv_sqrt[None, :]


if __name__ == "__main__":
    key = jax.random.PRNGKey(0)
    k_model, k_lap0, k_lap1, k_data = jax.random.split(key, 4)

    num_dict = {"user": 120, "item": 136, "month": 12, "day": 31,
                "sex": 2, "age": 10, "dayofweek": 7}
    embed_size = 40                     # divisible by 5 (5 feature sub-embeddings)
    layer_size = [40, 40]               # two propagation layers
    emb_ratio = 0.5

    lap_list = [make_normalized_laplacian(k_lap0, num_dict["user"], num_dict["item"]),
                make_normalized_laplacian(k_lap1, num_dict["user"], num_dict["item"])]

    model = NGCFPallas(embed_size, layer_size, emb_ratio, lap_list, num_dict,
                       k_model)

    B = 4
    kd = jax.random.split(k_data, 9)
    year = 2015                          # host-side int (no device->host sync)
    u_id = jnp.array([3, 17, 42, 99], jnp.int32)
    age = jax.random.randint(kd[0], (B,), 0, num_dict["age"])
    sex = jax.random.randint(kd[1], (B,), 0, num_dict["sex"])
    month = jax.random.randint(kd[2], (B,), 0, num_dict["month"])
    day = jax.random.randint(kd[3], (B,), 0, num_dict["day"])
    dow = jax.random.randint(kd[4], (B,), 0, num_dict["dayofweek"])
    pos_item = jax.random.randint(kd[5], (B,), 0, num_dict["item"])
    neg_item = jax.random.randint(kd[6], (B,), 0, num_dict["item"])

    u_e, pos_e, neg_e = model.forward(year, u_id, age, sex, month, day, dow,
                                      pos_item, neg_item, node_flag=False,
                                      check=True)
    jax.block_until_ready((u_e, pos_e, neg_e))

    out_dim = embed_size + sum(layer_size)
    assert u_e.shape == (B, out_dim)
    assert pos_e.shape == (B, out_dim)
    assert neg_e.shape == (B, out_dim)
    print("KERNEL_OK")
</pallas_src>

<mosaic_0001>
module attributes {stable_mosaic.version = 11 : i64} {
  func.func @_ngcf_half_kernel(%arg0: i32, %arg1: i32, %arg2: memref<128x256xbf16, #tpu.memory_space<vmem>>, %arg3: memref<256x128xbf16, #tpu.memory_space<vmem>>, %arg4: memref<128x128xf32, #tpu.memory_space<vmem>>, %arg5: memref<128x128xbf16, #tpu.memory_space<vmem>>, %arg6: memref<128x128xbf16, #tpu.memory_space<vmem>>, %arg7: memref<1x128xf32, #tpu.memory_space<vmem>>, %arg8: memref<128x128xf32, #tpu.memory_space<vmem>>, %arg9: memref<128x128xbf16, #tpu.memory_space<vmem>>, %arg10: memref<128x128xf32, #tpu.memory_space<vmem>>, %arg11: memref<128x128xf32, #tpu.memory_space<vmem>>) attributes {dimension_semantics = [#tpu.dimension_semantics<parallel>, #tpu.dimension_semantics<arbitrary>], iteration_bounds = array<i64: 2, 1>, scalar_prefetch = 0 : i64, scratch_operands = 1 : i64, tpu.core_type = #tpu.core_type<tc>, window_params = [{transform_indices = @transform_0, window_bounds = array<i64: 128, 256>}, {pipeline_mode = #tpu.pipeline_mode<synchronous>, transform_indices = @transform_1, window_bounds = array<i64: 256, 128>}, {transform_indices = @transform_2, window_bounds = array<i64: 128, 128>}, {pipeline_mode = #tpu.pipeline_mode<synchronous>, transform_indices = @transform_3, window_bounds = array<i64: 128, 128>}, {pipeline_mode = #tpu.pipeline_mode<synchronous>, transform_indices = @transform_4, window_bounds = array<i64: 128, 128>}, {pipeline_mode = #tpu.pipeline_mode<synchronous>, transform_indices = @transform_5, window_bounds = array<i64: 1, 128>}, {transform_indices = @transform_6, window_bounds = array<i64: 128, 128>}, {transform_indices = @transform_7, window_bounds = array<i64: 128, 128>}, {transform_indices = @transform_8, window_bounds = array<i64: 128, 128>}]} {
    %c256_i32 = arith.constant 256 : i32
    %0 = arith.muli %arg1, %c256_i32 : i32
    %1 = tpu.assume_multiple %0, 128 : i32
    %2 = arith.index_cast %1 : i32 to index
    %c0 = arith.constant 0 : index
    %3 = vector.load %arg3[%2, %c0] : memref<256x128xbf16, #tpu.memory_space<vmem>>, vector<256x128xbf16>
    %c0_0 = arith.constant 0 : index
    %c0_1 = arith.constant 0 : index
    %4 = vector.load %arg2[%c0_0, %c0_1] : memref<128x256xbf16, #tpu.memory_space<vmem>>, vector<128x256xbf16>
    %cst = arith.constant dense<0.000000e+00> : vector<128x128xf32>
    %5 = tpu.matmul %4, %3, %cst {dimension_numbers = #tpu.dot_dimension_numbers<[1], [0], [0], [1], [0, 0, 1, 1], [], []>} : vector<128x256xbf16>, vector<256x128xbf16>, vector<128x128xf32> -> vector<128x128xf32>
    %c0_i32 = arith.constant 0 : i32
    %6 = arith.cmpi eq, %arg1, %c0_i32 : i32
    %7 = arith.extui %6 : i1 to i32
    %c0_i32_2 = arith.constant 0 : i32
    %8 = arith.cmpi ne, %7, %c0_i32_2 : i32
    scf.if %8 {
      %c0_7 = arith.constant 0 : index
      %c0_8 = arith.constant 0 : index
      %15 = vector.load %arg11[%c0_7, %c0_8] : memref<128x128xf32, #tpu.memory_space<vmem>>, vector<128x128xf32>
      tpu.vector_store %arg11[%c0_7, %c0_8], %5 {strides = array<i32>} : memref<128x128xf32, #tpu.memory_space<vmem>>, vector<128x128xf32>,
    } else {
    }
    %c0_i32_3 = arith.constant 0 : i32
    %9 = arith.cmpi sgt, %arg1, %c0_i32_3 : i32
    %10 = arith.extui %9 : i1 to i32
    %c0_i32_4 = arith.constant 0 : i32
    %11 = arith.cmpi ne, %10, %c0_i32_4 : i32
    scf.if %11 {
      %c0_7 = arith.constant 0 : index
      %c0_8 = arith.constant 0 : index
      %15 = vector.load %arg11[%c0_7, %c0_8] : memref<128x128xf32, #tpu.memory_space<vmem>>, vector<128x128xf32>
      %16 = arith.addf %15, %5 : vector<128x128xf32>
      %c0_9 = arith.constant 0 : index
      %c0_10 = arith.constant 0 : index
      %17 = vector.load %arg11[%c0_9, %c0_10] : memref<128x128xf32, #tpu.memory_space<vmem>>, vector<128x128xf32>
      tpu.vector_store %arg11[%c0_9, %c0_10], %16 {strides = array<i32>} : memref<128x128xf32, #tpu.memory_space<vmem>>, vector<128x128xf32>,
    } else {
    }
    %c0_i32_5 = arith.constant 0 : i32
    %12 = arith.cmpi eq, %arg1, %c0_i32_5 : i32
    %13 = arith.extui %12 : i1 to i32
    %c0_i32_6 = arith.constant 0 : i32
    %14 = arith.cmpi ne, %13, %c0_i32_6 : i32
    scf.if %14 {
      %c0_7 = arith.constant 0 : index
      %c0_8 = arith.constant 0 : index
      %15 = vector.load %arg11[%c0_7, %c0_8] : memref<128x128xf32, #tpu.memory_space<vmem>>, vector<128x128xf32>
      %c0_9 = arith.constant 0 : index
      %c0_10 = arith.constant 0 : index
      %16 = vector.load %arg4[%c0_9, %c0_10] : memref<128x128xf32, #tpu.memory_space<vmem>>, vector<128x128xf32>
      %17 = arith.addf %15, %16 : vector<128x128xf32>
      %18 = arith.truncf %17 : vector<128x128xf32> to vector<128x128xbf16>
      %19 = arith.mulf %15, %16 : vector<128x128xf32>
      %20 = arith.truncf %19 : vector<128x128xf32> to vector<128x128xbf16>
      %c0_11 = arith.constant 0 : index
      %c0_12 = arith.constant 0 : index
      %21 = vector.load %arg5[%c0_11, %c0_12] : memref<128x128xbf16, #tpu.memory_space<vmem>>, vector<128x128xbf16>
      %cst_13 = arith.constant dense<0.000000e+00> : vector<128x128xf32>
      %22 = tpu.matmul %18, %21, %cst_13 {dimension_numbers = #tpu.dot_dimension_numbers<[1], [0], [0], [1], [0, 0, 1, 1], [], []>} : vector<128x128xbf16>, vector<128x128xbf16>, vector<128x128xf32> -> vector<128x128xf32>
      %c0_14 = arith.constant 0 : index
      %c0_15 = arith.constant 0 : index
      %23 = vector.load %arg6[%c0_14, %c0_15] : memref<128x128xbf16, #tpu.memory_space<vmem>>, vector<128x128xbf16>
      %cst_16 = arith.constant dense<0.000000e+00> : vector<128x128xf32>
      %24 = tpu.matmul %20, %23, %cst_16 {dimension_numbers = #tpu.dot_dimension_numbers<[1], [0], [0], [1], [0, 0, 1, 1], [], []>} : vector<128x128xbf16>, vector<128x128xbf16>, vector<128x128xf32> -> vector<128x128xf32>
      %25 = arith.addf %22, %24 : vector<128x128xf32>
      %c0_17 = arith.constant 0 : index
      %c0_18 = arith.constant 0 : index
      %26 = vector.load %arg7[%c0_17, %c0_18] : memref<1x128xf32, #tpu.memory_space<vmem>>, vector<1x128xf32>
      %27 = vector.broadcast %26 : vector<1x128xf32> to vector<128x128xf32>
      %28 = arith.addf %25, %27 : vector<128x128xf32>
      %cst_19 = arith.constant 0.000000e+00 : f32
      %29 = vector.broadcast %cst_19 : f32 to vector<128x128xf32>
      %30 = arith.cmpf oge, %28, %29 : vector<128x128xf32>
      %cst_20 = arith.constant 2.000000e-01 : f32
      %31 = vector.broadcast %cst_20 : f32 to vector<128x128xf32>
      %32 = arith.mulf %31, %28 : vector<128x128xf32>
      %33 = arith.select %30, %28, %32 : vector<128x128xi1>, vector<128x128xf32>
      %34 = arith.mulf %33, %33 : vector<128x128xf32>
      %cst_21 = arith.constant dense<0.000000e+00> : vector<128xf32>
      %35 = vector.multi_reduction <add>, %34, %cst_21 [1] : vector<128x128xf32> to vector<128xf32>
      %36 = vector.shape_cast %35 : vector<128xf32> to vector<128x1xf32>
      %cst_22 = arith.constant 1.000000e-24 : f32
      %37 = vector.broadcast %cst_22 : f32 to vector<128x1xf32>
      %38 = arith.maximumf %36, %37 : vector<128x1xf32>
      %39 = math.rsqrt %38 : vector<128x1xf32>
      %40 = vector.broadcast %39 : vector<128x1xf32> to vector<128x128xf32>
      %41 = arith.mulf %33, %40 : vector<128x128xf32>
      %c0_23 = arith.constant 0 : index
      %c0_24 = arith.constant 0 : index
      %42 = vector.load %arg8[%c0_23, %c0_24] : memref<128x128xf32, #tpu.memory_space<vmem>>, vector<128x128xf32>
      tpu.vector_store %arg8[%c0_23, %c0_24], %33 {strides = array<i32>} : memref<128x128xf32, #tpu.memory_space<vmem>>, vector<128x128xf32>,
      %43 = arith.truncf %33 : vector<128x128xf32> to vector<128x128xbf16>
      %c0_25 = arith.constant 0 : index
      %c0_26 = arith.constant 0 : index
      %44 = vector.load %arg9[%c0_25, %c0_26] : memref<128x128xbf16, #tpu.memory_space<vmem>>, vector<128x128xbf16>
      tpu.vector_store %arg9[%c0_25, %c0_26], %43 {strides = array<i32>} : memref<128x128xbf16, #tpu.memory_space<vmem>>, vector<128x128xbf16>,
      %c0_27 = arith.constant 0 : index
      %c0_28 = arith.constant 0 : index
      %45 = vector.load %arg10[%c0_27, %c0_28] : memref<128x128xf32, #tpu.memory_space<vmem>>, vector<128x128xf32>
      tpu.vector_store %arg10[%c0_27, %c0_28], %41 {strides = array<i32>} : memref<128x128xf32, #tpu.memory_space<vmem>>, vector<128x128xf32>,
    } else {
    }
    return
  }
  func.func @transform_0(%arg0: i32, %arg1: i32) -> (i32, i32) {
    %c0_i32 = arith.constant 0 : i32
    return %arg0, %arg1 : i32, i32
  }
  func.func @transform_1(%arg0: i32, %arg1: i32) -> (i32, i32) {
    %c0_i32 = arith.constant 0 : i32
    %c0_i32_0 = arith.constant 0 : i32
    %c0_i32_1 = arith.constant 0 : i32
    return %c0_i32, %c0_i32_0 : i32, i32
  }
  func.func @transform_2(%arg0: i32, %arg1: i32) -> (i32, i32) {
    %c0_i32 = arith.constant 0 : i32
    %c0_i32_0 = arith.constant 0 : i32
    return %arg0, %c0_i32 : i32, i32
  }
  func.func @transform_3(%arg0: i32, %arg1: i32) -> (i32, i32) {
    %c0_i32 = arith.constant 0 : i32
    %c0_i32_0 = arith.constant 0 : i32
    %c0_i32_1 = arith.constant 0 : i32
    return %c0_i32, %c0_i32_0 : i32, i32
  }
  func.func @transform_4(%arg0: i32, %arg1: i32) -> (i32, i32) {
    %c0_i32 = arith.constant 0 : i32
    %c0_i32_0 = arith.constant 0 : i32
    %c0_i32_1 = arith.constant 0 : i32
    return %c0_i32, %c0_i32_0 : i32, i32
  }
  func.func @transform_5(%arg0: i32, %arg1: i32) -> (i32, i32) {
    %c0_i32 = arith.constant 0 : i32
    %c0_i32_0 = arith.constant 0 : i32
    %c0_i32_1 = arith.constant 0 : i32
    return %c0_i32, %c0_i32_0 : i32, i32
  }
  func.func @transform_6(%arg0: i32, %arg1: i32) -> (i32, i32) {
    %c0_i32 = arith.constant 0 : i32
    %c0_i32_0 = arith.constant 0 : i32
    return %arg0, %c0_i32 : i32, i32
  }
  func.func @transform_7(%arg0: i32, %arg1: i32) -> (i32, i32) {
    %c0_i32 = arith.constant 0 : i32
    %c0_i32_0 = arith.constant 0 : i32
    return %arg0, %c0_i32 : i32, i32
  }
  func.func @transform_8(%arg0: i32, %arg1: i32) -> (i32, i32) {
    %c0_i32 = arith.constant 0 : i32
    %c0_i32_0 = arith.constant 0 : i32
    return %arg0, %c0_i32 : i32, i32
  }
}

</mosaic_0001>

<bundles_post_ra>
// kernel: tpu_custom_call.1
= control target key start
LH: loop header
LB: loop body
LE: loop exit
PB: predicated region body
PF: predicated region fallthrough
CT: control target
= control target key end

     0   :  { %s3360_s0 = inlined_call_operand.hbm [shape: bf16[256,256], index: 0, kind: input, shape index: {}]   ;;  %s3361_s1 = inlined_call_operand.hbm [shape: bf16[256,128], index: 1, kind: input, shape index: {}]   ;;  %s3362_s2 = inlined_call_operand.hbm [shape: f32[256,128], index: 2, kind: input, shape index: {}]   ;;  %s3363_s3 = inlined_call_operand.hbm [shape: bf16[128,128], index: 3, kind: input, shape index: {}]   ;;  %s3364_s4 = inlined_call_operand.hbm [shape: bf16[128,128], index: 4, kind: input, shape index: {}]   ;;  %s3365_s5 = inlined_call_operand.vmem [shape: f32[1,128], index: 5, kind: input, shape index: {}]   ;;  %s3366_s6 = inlined_call_operand.hbm [shape: f32[256,128], index: 6, kind: output, shape index: {0}]   ;;  %s3367_s7 = inlined_call_operand.hbm [shape: bf16[256,128], index: 7, kind: output, shape index: {1}]   ;;  %s3368_s8 = inlined_call_operand.hbm [shape: f32[256,128], index: 8, kind: output, shape index: {2}]  }
   0x1   :  { %3396 = sst [smem:[#allocation31_spill]] %s3360_s0 }
   0x2   :  { %3397 = sst [smem:[#allocation32_spill]] %s3361_s1 }
   0x3   :  { %3398 = sst [smem:[#allocation33_spill]] %s3366_s6 }
   0x4   :  { %3399 = sst [smem:[#allocation34_spill]] %s3367_s7 }
   0x5   :  { %3400 = sst [smem:[#allocation35_spill]] %s3368_s8 }
   0x6   :  { %14 = vsyncpa [#allocation4], 0 }
   0x7   :  { %16 = vsyncpa [#allocation4 + $0x1], 0 }
   0x8   :  { %17 = vsyncpa [#allocation7], 0 }
   0x9   :  { %18 = vsyncpa [#allocation11], 0 }
   0xa   :  { %19 = vsyncpa [#allocation5], 0 }
   0xb   :  { %21 = vsyncpa [#allocation5 + $0x1], 0 }
   0xc   :  { %22 = vsyncpa [#allocation14], 0 }
   0xd   :  { %24 = vsyncpa [#allocation14 + $0x1], 0  ;;  %s2694_s27 = smov 0   ;;  %s2696_s28 = smov 0  }
   0xe   :  { %s2698_s29 = smov 0   ;;  %s2700_s30 = smov 0  }
   0xf   :  { %s2702_s9 = smov 0   ;;  %s2704_s10 = smov 0  }
  0x10 LB: > { %3401 = sst [smem:[#allocation23_spill]] %s2611_s27  ;;  %s2725_s11 = sadd.s32 4294967295, %s2631_s10   ;;  %s2631_s10 = sphi %s2704_s10, %s30_s10   ;;  %s2627_s9 = sphi %s2702_s9, %s3453_s9   ;;  %s2623_s30 = sphi %s2700_s30, %s3452_s30   ;;  %s2619_s29 = sphi %s2698_s29, %s3448_s29   ;;  %s2615_s28 = sphi %s2696_s28, %s3451_s28   ;;  %s2611_s27 = sphi %s2694_s27, %s3450_s27  }
  0x11   : > { %3402 = sst [smem:[#allocation24_spill]] %s2619_s29  ;;  %s3372_s12 = sadd.s32 4294967294, %s2631_s10  }
  0x12   : > { %3403 = sst [smem:[#allocation25_spill]] %s2623_s30  ;;  %p64_p0 = scmp.ne.s32.totalorder %s2615_s28, %s2611_s27 }
  0x13   : > { %3404 = sst [smem:[#allocation26_spill]] %s2631_s10  ;;  %p3369_p1 = scmp.eq.s32.totalorder %s2725_s11, 0 }
  0x14   : > { %p204_p3 = scmp.eq.s32.totalorder %s3372_s12, 1  ;;  %p1783_p5 = scmp.ge.s32.totalorder %s2631_s10, 1 }
  0x15   : > { %p2736_p4 = por %p3369_p1, %p64_p0  ;;  %p263_p7 = scmp.lt.s32.totalorder %s2631_s10, 3 }
  0x16   : > { %p2741_p6 = por %p204_p3, %p64_p0  ;;  %s2633_s16 = smov [#allocation6]  }
  0x17   : > { %s3405_s13 = scalar_select %p2736_p4, 1, 0 }
  0x18   : > { %s3406_s14 = scalar_select %p2741_p6, 1, 0 }
  0x19   : > { %p2746_p8 = pnand %p1783_p5, %p263_p7  ;;  %s275_s17 = sshll.u32 %s2633_s16, 4  ;;  %s276_s17 = int_to_ptr.vmem [resolvable:$true] %s275_s17 }
  0x1a   : > { %3407 = sst [smem:[#allocation27_spill]] %s3406_s14  ;;  %s42_s19 = sadd.s32 1, %s2627_s9 }
  0x1b   : > { %s3408_s15 = scalar_select %p2746_p8, 1, 0 }
  0x1c   : > { %p2147_p9 = pneg %p2746_p8  ;;  %s3410_s1 = sld [smem:[#allocation32_spill]] }
  0x1e   : > { %p2755_p11 = pnand %p2147_p9, %p3369_p1 }
  0x20   : > { %s3409_s18 = scalar_select %p2755_p11, 1, 0 }
  0x21   : > { %p2768_p13 = pneg %p2755_p11 }
  0x22   : > { %s2329_s22 = scalar_lea.hbm %s3410_s1, 2048 }
  0x23   : > { %p2330_p12 = scmp.ne.s32.totalorder %s3410_s1, %s2329_s22  ;;  %p2336_p5 = scmp.lt.u32.totalorder %s2329_s22, %s3410_s1 }
  0x25   : > { %p2332_p0 = pnand %p2768_p13, %p2330_p12 }
  0x27   : > { %p2333_p3 = pneg %p2332_p0 }
  0x29   : > { %p2338_p7 = pnand %p2336_p5, %p2333_p3 }
  0x2b   : > { %2341 = shalt.err (!%p2338_p7)
}
  0x2c   : > { %s2342_s20 = scalar_lea.vmem %s276_s17, 2048  ;;  %p2350_p2 = scmp.lt.s32.totalorder %s276_s17, %s276_s17 }
  0x2d   : > { %p2343_p9 = scmp.ne.s32.totalorder %s276_s17, %s2342_s20  ;;  %p2351_p6 = scmp.lt.s32.totalorder %s2342_s20, %s2342_s20 }
  0x2f   : > { %p2345_p10 = pnand %p2343_p9, %p2768_p13  ;;  %p2352_p4 = por %p2351_p6, %p2350_p2 }
  0x31   : > { %p2346_p1 = pneg %p2345_p10 }
  0x33   : > { %p2353_p8 = pnand %p2352_p4, %p2346_p1 }
  0x35   : > { %2356 = shalt.err (!%p2353_p8)
}
  0x36   : > { %s3373_s21 = smov 64   ;;  %s3375_s22 = smov 4  }
  0x37   : > { %2150 = dma.hbm_to_vmem [thread:$0]  (!%p2755_p11), %s3410_s1, 2048, %s276_s17, [#allocation7], %s3373_s21, %s3373_s21, %s3375_s22  }
  0x38   : > { %p44_p1 = scmp.ge.s32.totalorder %s42_s19, 2  ;;  %s51_s26 = sadd.s32 1, %s2619_s29 }
  0x39   : > { %p58_p2 = scmp.ne.s32.totalorder %s2619_s29, %s2615_s28  ;;  %p59_p4 = scmp.eq.s32.totalorder %s2631_s10, 0 }
  0x3a   : > { %s3455_s19 = smov (%p44_p1, %s42_s19), 0  ;;  %p3414_p8 = scmp.eq.s32.totalorder %s2725_s11, 1 }
  0x3b   : > { %3412 = sst [smem:[#allocation28_spill]] %s3455_s19  ;;  %p2793_p6 = por %p59_p4, %p58_p2 }
  0x3c   : > { %p2799_p10 = por %p3414_p8, %p58_p2  ;;  %s46_s23 = ssub.s32 %s2627_s9, %s3455_s19 }
  0x3d   : > { %p2177_p12 = scmp.lt.s32.totalorder %s2631_s10, 2  ;;  %p49_p0 = scmp.eq.s32.totalorder %s46_s23, 0 }
  0x3e   : > { %s3415_s20 = scalar_select %p2799_p10, 1, 0 }
  0x3f   : > { %s318_s17 = sand.u32 1, %s2631_s10   ;;  %s320_s24 = sand.u32 1, %s2619_s29  }
  0x40   : > { %3416 = sst [smem:[#allocation29_spill]] %s3415_s20  ;;  %s2811_s21 = sshll.u32 %s320_s24, 7 }
  0x41   : > { %s2809_s12 = scalar_select %p49_p0, %s2619_s29, %s51_s26  }
  0x42   : > { %s3380_s22 = sshll.u32 %s2627_s9, 11  ;;  %s3418_s0 = sld [smem:[#allocation31_spill]] }
  0x43   : > { %3417 = sst [smem:[#allocation30_spill]] %s2809_s12  ;;  %s322_s19 = scalar_lea.vmem [#allocation3], %s2811_s21 }
  0x44   : > { %s332_s23 = sshll.u32 %s322_s19, 4  ;;  %p2824_p3 = pnand %p2177_p12, %p2793_p6  ;;  %s2828_s23 = int_to_ptr.vmem [resolvable:$true] %s332_s23 }
  0x45   : > { %s2830_s24 = scalar_lea.sflag [#allocation4], %s318_s17 }
  0x46   : > { %s3419_s26 = scalar_select %p2824_p3, 1, 0 }
  0x47   : > { %p3393_p7 = pneg %p2824_p3 }
  0x48   : > { %s2819_s27 = scalar_lea.hbm %s3418_s0, %s3380_s22  ;;  %s2362_s16 = scalar_lea.hbm %s3418_s0, 4096 }
  0x49   : > { %s2357_s1 = scalar_lea.hbm %s2819_s27, 2048  ;;  %p2363_p2 = scmp.lt.u32.totalorder %s2819_s27, %s3418_s0 }
  0x4a   : > { %p2358_p5 = scmp.ne.s32.totalorder %s2819_s27, %s2357_s1  ;;  %p2364_p4 = scmp.lt.u32.totalorder %s2362_s16, %s2357_s1 }
  0x4b   : > { %p2366_p8 = scmp.lt.u32.totalorder %s2357_s1, %s2819_s27 }
  0x4c   : > { %p2360_p9 = pnand %p3393_p7, %p2358_p5  ;;  %p2365_p6 = por %p2364_p4, %p2363_p2 }
  0x4e   : > { %p2361_p1 = pneg %p2360_p9  ;;  %p2367_p12 = por %p2366_p8, %p2365_p6 }
  0x50   : > { %p2368_p0 = pnand %p2367_p12, %p2361_p1 }
  0x52   : > { %2371 = shalt.err (!%p2368_p0)
}
  0x53   : > { %s2372_s17 = scalar_lea.vmem %s2828_s23, 2048  ;;  %s2636_s14 = smov [#allocation3]  }
  0x54   : > { %p2373_p5 = scmp.ne.s32.totalorder %s2828_s23, %s2372_s17  ;;  %s2377_s19 = sshll.u32 %s2636_s14, 4  ;;  %s2378_s19 = int_to_ptr.vmem [resolvable:$false] %s2377_s19 }
  0x55   : > { %s2379_s12 = scalar_lea.vmem %s2378_s19, 4096  ;;  %p2380_p11 = scmp.lt.s32.totalorder %s2828_s23, %s2378_s19 }
  0x56   : > { %p2375_p9 = pnand %p2373_p5, %p3393_p7  ;;  %p2381_p2 = scmp.lt.s32.totalorder %s2379_s12, %s2372_s17 }
  0x58   : > { %p2376_p10 = pneg %p2375_p9  ;;  %p2382_p4 = por %p2381_p2, %p2380_p11 }
  0x5a   : > { %p2383_p6 = pnand %p2382_p4, %p2376_p10 }
  0x5c   : > { %2386 = shalt.err (!%p2383_p6)
}
  0x5d   : > { %s2637_s22 = smov 128   ;;  %s2638_s1 = smov 8  }
  0x5e   : > { %2160 = dma.hbm_to_vmem [thread:$0]  (!%p2824_p3), %s2819_s27, 2048, %s2828_s23, %s2830_s24, %s2637_s22, %s2637_s22, %s2638_s1  }
  0x5f   : > { %s3420_s16 = sshll.u32 %s2627_s9, 11  ;;  %s346_s12 = scalar_lea.vmem [#allocation8], %s2811_s21 }
  0x60   : > { %s2866_s19 = scalar_lea.hbm %s3362_s2, %s3420_s16  ;;  %s353_s0 = sshll.u32 %s346_s12, 4  ;;  %s2890_s0 = int_to_ptr.vmem [resolvable:$true] %s353_s0 }
  0x61   : > { %s2639_s29 = smov [#allocation9]   ;;  %s2387_s7 = scalar_lea.hbm %s3363_s3, 1024 }
  0x62   : > { %s288_s10 = sshll.u32 %s2639_s29, 4  ;;  %p2388_p11 = scmp.ne.s32.totalorder %s3363_s3, %s2387_s7  ;;  %s289_s10 = int_to_ptr.vmem [resolvable:$true] %s288_s10 }
  0x63   : > { %p2394_p8 = scmp.lt.u32.totalorder %s2387_s7, %s3363_s3 }
  0x64   : > { %p2390_p10 = pnand %p2388_p11, %p2768_p13 }
  0x66   : > { %p2391_p1 = pneg %p2390_p10 }
  0x68   : > { %p2396_p12 = pnand %p2394_p8, %p2391_p1 }
  0x6a   : > { %2399 = shalt.err (!%p2396_p12)
}
  0x6b   : > { %s2400_s21 = scalar_lea.vmem %s289_s10, 1024  ;;  %p2408_p2 = scmp.lt.s32.totalorder %s289_s10, %s289_s10 }
  0x6c   : > { %p2401_p0 = scmp.ne.s32.totalorder %s289_s10, %s2400_s21  ;;  %p2409_p4 = scmp.lt.s32.totalorder %s2400_s21, %s2400_s21 }
  0x6e   : > { %p2403_p5 = pnand %p2401_p0, %p2768_p13  ;;  %p2410_p6 = por %p2409_p4, %p2408_p2 }
  0x70   : > { %p2404_p9 = pneg %p2403_p5 }
  0x72   : > { %p2411_p7 = pnand %p2410_p6, %p2404_p9 }
  0x74   : > { %2414 = shalt.err (!%p2411_p7)
}
  0x75   : > { %p3421_p11 = scmp.ne.s32.totalorder %s3409_s18, 0  ;;  %s3422_s6 = smov 4  }
  0x76   : > { %s3423_s8 = smov 64   ;;  %s2640_s30 = smov [#allocation10]  }
  0x77   : > { %2153 = dma.hbm_to_vmem [thread:$0]  (!%p3421_p11), %s3363_s3, 1024, %s289_s10, [#allocation7], %s3423_s8, %s3423_s8, %s3422_s6  }
  0x78   : > { %s301_s20 = sshll.u32 %s2640_s30, 4  ;;  %s2415_s17 = scalar_lea.hbm %s3364_s4, 1024  ;;  %s302_s20 = int_to_ptr.vmem [resolvable:$true] %s301_s20 }
  0x79   : > { %p2416_p7 = scmp.ne.s32.totalorder %s3364_s4, %s2415_s17  ;;  %p2422_p8 = scmp.lt.u32.totalorder %s2415_s17, %s3364_s4 }
  0x7b   : > { %p2418_p10 = pnand %p2416_p7, %p2768_p13 }
  0x7d   : > { %p2419_p1 = pneg %p2418_p10 }
  0x7f   : > { %p2424_p12 = pnand %p2422_p8, %p2419_p1 }
  0x81   : > { %2427 = shalt.err (!%p2424_p12)
}
  0x82   : > { %s2428_s10 = scalar_lea.vmem %s302_s20, 1024  ;;  %p2436_p2 = scmp.lt.s32.totalorder %s302_s20, %s302_s20 }
  0x83   : > { %p2429_p0 = scmp.ne.s32.totalorder %s302_s20, %s2428_s10  ;;  %p2437_p4 = scmp.lt.s32.totalorder %s2428_s10, %s2428_s10 }
  0x85   : > { %p2431_p5 = pnand %p2429_p0, %p2768_p13  ;;  %p2438_p6 = por %p2437_p4, %p2436_p2 }
  0x87   : > { %p2432_p9 = pneg %p2431_p5 }
  0x89   : > { %p2439_p3 = pnand %p2438_p6, %p2432_p9 }
  0x8b   : > { %2442 = shalt.err (!%p2439_p3)
}
  0x8c   : > { %2156 = dma.hbm_to_vmem [thread:$0]  (!%p3421_p11), %s3364_s4, 1024, %s302_s20, [#allocation11], %s3423_s8, %s3423_s8, %s3422_s6  }
  0x8d   : > { %s2443_s25 = scalar_lea.hbm %s2866_s19, 2048  ;;  %p3424_p7 = scmp.ne.s32.totalorder %s3419_s26, 0 }
  0x8e   : > { %p2444_p13 = scmp.ne.s32.totalorder %s2866_s19, %s2443_s25  ;;  %s2448_s16 = scalar_lea.hbm %s3362_s2, 4096 }
  0x8f   : > { %p3425_p10 = pneg %p3424_p7  ;;  %p2449_p8 = scmp.lt.u32.totalorder %s2866_s19, %s3362_s2 }
  0x90   : > { %p2450_p12 = scmp.lt.u32.totalorder %s2448_s16, %s2443_s25  ;;  %p2452_p5 = scmp.lt.u32.totalorder %s2443_s25, %s2866_s19 }
  0x91   : > { %p2446_p1 = pnand %p2444_p13, %p3425_p10 }
  0x92   : > { %p2451_p0 = por %p2450_p12, %p2449_p8 }
  0x93   : > { %p2447_p3 = pneg %p2446_p1 }
  0x94   : > { %p2453_p9 = por %p2452_p5, %p2451_p0 }
  0x96   : > { %p2454_p2 = pnand %p2453_p9, %p2447_p3 }
  0x98   : > { %2457 = shalt.err (!%p2454_p2)
}
  0x99   : > { %s2458_s6 = scalar_lea.vmem %s2890_s0, 2048  ;;  %p3426_p4 = pmov %p3425_p10 }
  0x9a   : > { %p2459_p11 = scmp.ne.s32.totalorder %s2890_s0, %s2458_s6  ;;  %s2641_s8 = smov [#allocation8]  }
  0x9b   : > { %s2463_s20 = sshll.u32 %s2641_s8, 4  ;;  %s2464_s20 = int_to_ptr.vmem [resolvable:$false] %s2463_s20 }
  0x9c   : > { %p2461_p6 = pnand %p2459_p11, %p3426_p4  ;;  %s2465_s12 = scalar_lea.vmem %s2464_s20, 4096 }
  0x9d   : > { %p2466_p10 = scmp.lt.s32.totalorder %s2890_s0, %s2464_s20  ;;  %p2467_p1 = scmp.lt.s32.totalorder %s2465_s12, %s2458_s6 }
  0x9e   : > { %p2462_p13 = pneg %p2461_p6 }
  0x9f   : > { %p2468_p8 = por %p2467_p1, %p2466_p10 }
  0xa1   : > { %p2469_p12 = pnand %p2468_p8, %p2462_p13 }
  0xa3   : > { %2472 = shalt.err (!%p2469_p12)
}
  0xa4   : > { %2163 = dma.hbm_to_vmem [thread:$0]  (!%p3424_p7), %s2866_s19, 2048, %s2890_s0, %s2830_s24, %s2637_s22, %s2637_s22, %s2638_s1  }
  0xa5   : > { %p3427_p3 = scmp.ne.s32.totalorder %s3408_s15, 0 }
  0xa6   : > { %s367_s27 = sand.u32 (!%p3427_p3), 1, %s2725_s11   ;;  %s2944_s23 = sand.u32 (!%p3427_p3), 1, %s2615_s28  }
  0xa7   : > { %365 = sbr.rel (%p3427_p3) target bundleno = 926 (0x39e), region = 44  ;;  %s2947_s21 = sshll.u32 (!%p3427_p3), %s2944_s23, 7 }
  0xa8   : > { %s368_s26 = scalar_lea.sflag (!%p3427_p3), [#allocation4], %s367_s27  ;;  %s2952_s10 = scalar_lea.vmem (!%p3427_p3), [#allocation3], %s2947_s21 }
  0xa9   : > { %p3428_p0 = scmp.ne.s32.totalorder (!%p3427_p3), %s3405_s13, 0 }
  0xae   : > { %2582 = dma.done.wait (%p3428_p0), %s368_s26, 2048  }
  0xaf   : > { %2584 = vsyncadd (%p3428_p0), %s368_s26, 4294965248  ;;  %p3429_p7 = scmp.eq.s32.totalorder %s2725_s11, 0 }
  0xb1   : > { %2586 = dma.done.wait (%p3429_p7), [#allocation7], 2048   ;;  %p3430_p5 = pmov %p3429_p7 }
  0xb2   : > { %s2963_s0 = scalar_lea.vmem [#allocation8], %s2947_s21 }
  0xb3   : > { %2588 = vsyncadd (%p3430_p5), [#allocation7], 4294965248 }
  0xb4   : > { %2590 = dma.done.wait (%p3428_p0), %s368_s26, 2048  }
  0xb5   : > { %2592 = vsyncadd (%p3428_p0), %s368_s26, 4294965248  ;;  %p3431_p9 = pmov %p3430_p5 }
  0xb6   : > { %p3432_p2 = pmov %p3430_p5 }
  0xb7   : > { %2594 = dma.done.wait (%p3431_p9), [#allocation7], 1024  }
  0xb8   : > { %2596 = vsyncadd (%p3432_p2), [#allocation7], 4294966272  ;;  %p3433_p11 = pmov %p3432_p2 }
  0xb9   : > { %p3434_p4 = pmov %p3432_p2 }
  0xba   : > { %2598 = dma.done.wait (%p3433_p11), [#allocation11], 1024  }
  0xbb   : > { %2600 = vsyncadd (%p3434_p4), [#allocation11], 4294966272  ;;  %v2241_v0 = vld [vmem:[#allocation6 + $0x40] sm:$0xff]   ;;  %v2243_v2 = vld [vmem:[#allocation6 + $0x48] sm:$0xff]   ;;  %s1802_s24 = sshll.u32 %s2944_s23, 6  ;;  %s3060_s22 = scalar_lea.vmem [#allocation12], %s2947_s21 }
  0xbc   : > { %v2242_v1 = vld [vmem:[#allocation6] sm:$0xff]   ;;  %1949 = vmatprep.subr.bf16.mxu0 %v2241_v0  ;;  %v2244_v3 = vld [vmem:[#allocation6 + $0x8] sm:$0xff]   ;;  %v2245_v4 = vld [vmem:[#allocation6 + $0x50] sm:$0xff]   ;;  %s3083_s1 = scalar_lea.vmem [#allocation13], %s1802_s24  ;;  %s3435_s19 = sld [smem:[#allocation25_spill]] }
  0xbd   : > { %1950 = vmatpush3.bf16.msra.mxu0 %v2242_v1  ;;  %v2246_v5 = vld [vmem:[#allocation6 + $0x10] sm:$0xff]   ;;  %v2247_v6 = vld [vmem:[#allocation6 + $0x58] sm:$0xff]   ;;  %v2249_v8 = vld [vmem:[#allocation6 + $0x60] sm:$0xff]   ;;  %s3436_s29 = sld [smem:[#allocation29_spill]]  ;;  %s1569_s25 = sshll.u32 %s3083_s1, 4  ;;  %s3199_s25 = int_to_ptr.vmem [resolvable:$true] %s1569_s25 }
  0xbe   : > { %1951 = vmatprep.subr.bf16.mxu0 %v2243_v2  ;;  %v2248_v7 = vld [vmem:[#allocation6 + $0x18] sm:$0xff]   ;;  %v2250_v9 = vld [vmem:[#allocation6 + $0x20] sm:$0xff]   ;;  %v2251_v10 = vld [vmem:[#allocation6 + $0x68] sm:$0xff]   ;;  %s3437_s16 = sld [smem:[#allocation34_spill]]  ;;  %s3203_s17 = scalar_lea.sflag [#allocation14], %s367_s27 }
  0xbf   : > { %v2259_v11 = vld [vmem:[%s2952_s10 + $0x4] ss:$8 sps:$4 sm:$0xff]   ;;  %v2253_v13 = vld [vmem:[#allocation6 + $0x70] sm:$0xff]   ;;  %v2255_v15 = vld [vmem:[#allocation6 + $0x78] sm:$0xff]   ;;  %s2473_s6 = scalar_lea.vmem %s3199_s25, 1024  ;;  %s2642_s8 = smov [#allocation13]  }
  0xc0   : > { %v2252_v12 = vld [vmem:[#allocation6 + $0x28] sm:$0xff]   ;;  %708 = vmatprep.mubr.bf16.mxu0 %v2259_v11  ;;  %v2254_v14 = vld [vmem:[#allocation6 + $0x30] sm:$0xff]   ;;  %v2256_v16 = vld [vmem:[#allocation6 + $0x38] sm:$0xff]   ;;  %p2474_p6 = scmp.ne.s32.totalorder %s3199_s25, %s2473_s6  ;;  %s2477_s20 = sshll.u32 %s2642_s8, 4  ;;  %s2478_s20 = int_to_ptr.vmem [resolvable:$false] %s2477_s20 }
  0xc1   : > { %1952 = vmatpush3.bf16.msra.mxu0 %v2244_v3  ;;  %v2281_v17 = vld [vmem:[#allocation10] sm:$0xff]   ;;  %v2282_v19 = vld [vmem:[#allocation10 + $0x8] sm:$0xff]   ;;  %v2260_v20 = vld [vmem:[%s2952_s10 + $0x14] ss:$8 sps:$4 sm:$0xff]   ;;  %s2479_s12 = scalar_lea.vmem %s2478_s20, 2048  ;;  %p2480_p8 = scmp.lt.s32.totalorder %s3199_s25, %s2478_s20 }
  0xc2   : > { %1953 = vmatprep.subr.bf16.mxu0 %v2245_v4  ;;  %v2257_v18 = vld [vmem:[%s2952_s10] ss:$8 sps:$4 sm:$0xff]   ;;  %2045 = vmatprep.subr.bf16.mxu1 %v2281_v17  ;;  %v2283_v21 = vld [vmem:[#allocation10 + $0x10] sm:$0xff]   ;;  %v2284_v22 = vld [vmem:[#allocation10 + $0x18] sm:$0xff]   ;;  %s1900_s7 = sshll.u32 %s3435_s19, 10  ;;  %p2481_p12 = scmp.lt.s32.totalorder %s2479_s12, %s2473_s6 }
  0xc3   : > { %2046 = vmatpush3.bf16.msra.mxu1 %v2281_v17  ;;  %v2262_v23 = vld [vmem:[%s2952_s10 + $0x10] ss:$8 sps:$4 sm:$0xff]   ;;  %v2263_v24 = vld [vmem:[%s2952_s10 + $0x24] ss:$8 sps:$4 sm:$0xff]   ;;  %v2265_v25 = vld [vmem:[%s2952_s10 + $0x20] ss:$8 sps:$4 sm:$0xff]  }
  0xc4   : > { %2047 = vmatprep.subr.bf16.mxu1 %v2282_v19  ;;  %v2266_v26 = vld [vmem:[%s2952_s10 + $0x34] ss:$8 sps:$4 sm:$0xff]   ;;  %v2268_v27 = vld [vmem:[%s2952_s10 + $0x30] ss:$8 sps:$4 sm:$0xff]   ;;  %v2269_v28 = vld [vmem:[%s2952_s10 + $0x44] ss:$8 sps:$4 sm:$0xff]   ;;  %s3197_s14 = scalar_lea.hbm %s3437_s16, %s1900_s7  ;;  %p2482_p3 = por %p2481_p12, %p2480_p8 }
  0xc5   : > { %1954 = vmatpush3.bf16.msra.mxu0 %v2246_v5  ;;  %v2271_v29 = vld [vmem:[%s2952_s10 + $0x40] ss:$8 sps:$4 sm:$0xff]   ;;  %v2272_v30 = vld [vmem:[%s2952_s10 + $0x54] ss:$8 sps:$4 sm:$0xff]   ;;  %v2274_v31 = vld [vmem:[%s2952_s10 + $0x50] ss:$8 sps:$4 sm:$0xff]  }
  0xc6   : > { %1955 = vmatprep.subr.bf16.mxu0 %v2247_v6  ;;  %v2275_v32 = vld [vmem:[%s2952_s10 + $0x64] ss:$8 sps:$4 sm:$0xff]   ;;  %v2277_v33 = vld [vmem:[%s2952_s10 + $0x60] ss:$8 sps:$4 sm:$0xff]   ;;  %v2278_v34 = vld [vmem:[%s2952_s10 + $0x74] ss:$8 sps:$4 sm:$0xff]  }
  0xc7   : > { %2048 = vmatpush3.bf16.msra.mxu1 %v2282_v19  ;;  %v2280_v35 = vld [vmem:[%s2952_s10 + $0x70] ss:$8 sps:$4 sm:$0xff]   ;;  %v2285_v36 = vld [vmem:[#allocation10 + $0x20] sm:$0xff]   ;;  %v2286_v37 = vld [vmem:[#allocation10 + $0x28] sm:$0xff]   ;;  %p3438_p13 = scmp.ne.s32.totalorder %s3436_s29, 0 }
  0xc8   : > { %2049 = vmatprep.subr.bf16.mxu1 %v2283_v21  ;;  %v2287_v38 = vld [vmem:[#allocation10 + $0x30] sm:$0xff]   ;;  %v2288_v39 = vld [vmem:[#allocation10 + $0x38] sm:$0xff]   ;;  %v2289_v40 = vld [vmem:[#allocation9] sm:$0xff]  }
  0xc9   : > { %1956 = vmatpush3.bf16.msra.mxu0 %v2248_v7  ;;  %v864_v45 = vld [vmem:[%s2963_s0] sm:$0xff]  ;;  %v865_v47 = vld [vmem:[%s2963_s0 + $0x8] sm:$0xff]  ;;  %v866_v59 = vld [vmem:[%s2963_s0 + $0x10] sm:$0xff]  ;;  %p2475_p10 = pnand %p2474_p6, %p3438_p13 }
  0xca   : > { %1957 = vmatprep.subr.bf16.mxu0 %v2249_v8  ;;  %v867_v61 = vld [vmem:[%s2963_s0 + $0x18] sm:$0xff]  ;;  %v2290_v6 = vld [vmem:[#allocation9 + $0x8] sm:$0xff]  }
  0xcb   : > { %2050 = vmatpush3.bf16.msra.mxu1 %v2283_v21  ;;  %v2292_v21 = vld [vmem:[#allocation9 + $0x18] sm:$0xff]   ;;  %p2476_p1 = pneg %p2475_p10 }
  0xcc   : > { %2051 = vmatprep.subr.bf16.mxu1 %v2284_v22 }
  0xcd   : > { %1958 = vmatpush3.bf16.msra.mxu0 %v2250_v9  ;;  %p2483_p0 = pnand %p2482_p3, %p2476_p1 }
  0xce   : > { %1959 = vmatprep.subr.bf16.mxu0 %v2251_v10  ;;  %v868_v10 = vld [vmem:[%s2963_s0 + $0x20] sm:$0xff] }
  0xcf   : > { %2052 = vmatpush3.bf16.msra.mxu1 %v2284_v22 }
  0xd0   : > { %2053 = vmatprep.subr.bf16.mxu1 %v2285_v36 }
  0xd1   : > { %1960 = vmatpush3.bf16.msra.mxu0 %v2252_v12  ;;  %v869_v12 = vld [vmem:[%s2963_s0 + $0x28] sm:$0xff] }
  0xd2   : > { %1961 = vmatprep.subr.bf16.mxu0 %v2253_v13 }
  0xd3   : > { %2054 = vmatpush3.bf16.msra.mxu1 %v2285_v36 }
  0xd4   : > { %2055 = vmatprep.subr.bf16.mxu1 %v2286_v37 }
  0xd5   : > { %1962 = vmatpush3.bf16.msra.mxu0 %v2254_v14  ;;  %v2291_v14 = vld [vmem:[#allocation9 + $0x10] sm:$0xff]  }
  0xd6   : > { %1963 = vmatprep.subr.bf16.mxu0 %v2255_v15 }
  0xd7   : > { %2056 = vmatpush3.bf16.msra.mxu1 %v2286_v37  ;;  %v2294_v37 = vld [vmem:[#allocation9 + $0x28] sm:$0xff]  }
  0xd8   : > { %2057 = vmatprep.subr.bf16.mxu1 %v2287_v38 }
  0xd9   : > { %1964 = vmatpush3.bf16.msra.mxu0 %v2256_v16 }
  0xdb   : > { %2058 = vmatpush3.bf16.msra.mxu1 %v2287_v38 }
  0xdc   : > { %709 = vmatmul.mubr.bf16.vlgmr.msra.gmra.mrb[0].mxu0 %v2257_v18  ;;  %2059 = vmatprep.subr.bf16.mxu1 %v2288_v39 }
  0xdd   : > { %716 = vmatprep.mubr.bf16.mxu0 %v2260_v20 }
  0xdf   : > { %2060 = vmatpush3.bf16.msra.mxu1 %v2288_v39 }
  0xe0   : > { %2077 = vmatprep.subr.bf16.mxu1 %v2289_v40 }
  0xe4   : > { %717 = vmatmul.mubr.bf16.gmra.mrb[4].mxu0 %v2262_v23 }
  0xe5   : > { %724 = vmatprep.mubr.bf16.mxu0 %v2263_v24 }
  0xec   : > { %725 = vmatmul.mubr.bf16.gmra.mrb[8].mxu0 %v2265_v25 }
  0xed   : > { %732 = vmatprep.mubr.bf16.mxu0 %v2266_v26  ;;  %v870_v26 = vld [vmem:[%s2963_s0 + $0x30] sm:$0xff] }
  0xf4   : > { %733 = vmatmul.mubr.bf16.gmra.mrb[12].mxu0 %v2268_v27 }
  0xf5   : > { %740 = vmatprep.mubr.bf16.mxu0 %v2269_v28  ;;  %v871_v28 = vld [vmem:[%s2963_s0 + $0x38] sm:$0xff] }
  0xfc   : > { %741 = vmatmul.mubr.bf16.gmra.mrb[16].mxu0 %v2271_v29 }
  0xfd   : > { %748 = vmatprep.mubr.bf16.mxu0 %v2272_v30  ;;  %v2293_v30 = vld [vmem:[#allocation9 + $0x20] sm:$0xff]  }
 0x104   : > { %749 = vmatmul.mubr.bf16.gmra.mrb[20].mxu0 %v2274_v31 }
 0x105   : > { %756 = vmatprep.mubr.bf16.mxu0 %v2275_v32 }
 0x10c   : > { %757 = vmatmul.mubr.bf16.gmra.mrb[24].mxu0 %v2277_v33 }
 0x10d   : > { %764 = vmatprep.mubr.bf16.mxu0 %v2278_v34 }
 0x114   : > { %765 = vmatmul.mubr.bf16.gmra.mrb[28].mxu0 %v2280_v35 }
 0x1af   : > { %v1965_v41 = vpop.f32.mrb[0].mxu0 }
 0x1b0   : > { %v1966_v42 = vpop.f32.mrb[1].mxu0 }
 0x1b1   : > { %v1967_v43 = vadd.f32 %v1966_v42, %v1965_v41  ;;  %v1968_v44 = vpop.f32.mrb[2].mxu0  ;;  %v872_v42 = vld [vmem:[%s2963_s0 + $0x40] sm:$0xff] }
 0x1b2   : > { %v1969_v46 = vpop.f32.mrb[3].mxu0 }
 0x1b3   : > { %v1970_v48 = vadd.f32 %v1969_v46, %v1968_v44  ;;  %v2995_v49 = vadd.f32 %v1967_v43, %v864_v45  ;;  %v904_v51 = vmul.f32 %v1967_v43, %v864_v45  ;;  %v873_v44 = vld [vmem:[%s2963_s0 + $0x48] sm:$0xff]  ;;  %v2295_v46 = vld [vmem:[#allocation9 + $0x30] sm:$0xff]  }
 0x1b5   : > { %v2997_v50 = vadd.f32 %v1970_v48, %v865_v47  ;;  %v905_v52 = vmul.f32 %v1970_v48, %v865_v47 }
 0x1b7   : > { %v1971_v53 = vpop.f32.mrb[4].mxu0  ;;  %v920_v54 = vpack.c.bf16 %v905_v52, %v904_v51  ;;  %v896_v55 = vpack.c.bf16 %v2997_v50, %v2995_v49  ;;  %v3048_v49 = vld [vmem:[%s3365_s5] ss:$0 sm:$0xff] }
 0x1b8   : > { %v1972_v56 = vpop.f32.mrb[5].mxu0 }
 0x1b9   : > { %v1973_v57 = vadd.f32 %v1972_v56, %v1971_v53  ;;  %v1974_v58 = vpop.f32.mrb[6].mxu0  ;;  %2061 = vmatprep.mubr.bf16.mxu1 %v920_v54  ;;  %v2296_v56 = vld [vmem:[#allocation9 + $0x38] sm:$0xff]  }
 0x1ba   : > { %v1975_v60 = vpop.f32.mrb[7].mxu0 }
 0x1bb   : > { %v1976_v62 = vadd.f32 %v1975_v60, %v1974_v58  ;;  %v3003_v63 = vadd.f32 %v1973_v57, %v866_v59  ;;  %v906_v0 = vmul.f32 %v1973_v57, %v866_v59 }
 0x1bd   : > { %v3005_v1 = vadd.f32 %v1976_v62, %v867_v61  ;;  %v907_v2 = vmul.f32 %v1976_v62, %v867_v61  ;;  %v874_v61 = vld [vmem:[%s2963_s0 + $0x50] sm:$0xff] }
 0x1bf   : > { %v897_v3 = vpack.c.bf16 %v3005_v1, %v3003_v63  ;;  %v1977_v4 = vpop.f32.mrb[8].mxu0  ;;  %v921_v5 = vpack.c.bf16 %v907_v2, %v906_v0  ;;  %v875_v0 = vld [vmem:[%s2963_s0 + $0x58] sm:$0xff] }
 0x1c0   : > { %v1978_v7 = vpop.f32.mrb[9].mxu0 }
 0x1c1   : > { %v1979_v8 = vadd.f32 %v1978_v7, %v1977_v4  ;;  %v1980_v9 = vpop.f32.mrb[10].mxu0  ;;  %2062 = vmatmul.mubr.bf16.vlgmr.msra.gmra.mrb[0].mxu1 %v921_v5 }
 0x1c2   : > { %v1981_v11 = vpop.f32.mrb[11].mxu0  ;;  %2078 = vmatpush3.bf16.msra.mxu1 %v2289_v40 }
 0x1c3   : > { %v1982_v13 = vadd.f32 %v1981_v11, %v1980_v9  ;;  %2079 = vmatprep.subr.bf16.mxu1 %v2290_v6  ;;  %v3011_v15 = vadd.f32 %v1979_v8, %v868_v10  ;;  %v908_v16 = vmul.f32 %v1979_v8, %v868_v10 }
 0x1c5   : > { %v3013_v17 = vadd.f32 %v1982_v13, %v869_v12  ;;  %v909_v18 = vmul.f32 %v1982_v13, %v869_v12 }
 0x1c6   : > { %2080 = vmatpush3.bf16.msra.mxu1 %v2290_v6 }
 0x1c7   : > { %v1983_v19 = vpop.f32.mrb[12].mxu0  ;;  %v922_v20 = vpack.c.bf16 %v909_v18, %v908_v16  ;;  %2081 = vmatprep.subr.bf16.mxu1 %v2291_v14  ;;  %v898_v22 = vpack.c.bf16 %v3013_v17, %v3011_v15  ;;  %v877_v18 = vld [vmem:[%s2963_s0 + $0x68] sm:$0xff] }
 0x1c8   : > { %v1984_v23 = vpop.f32.mrb[13].mxu0 }
 0x1c9   : > { %v1985_v24 = vadd.f32 %v1984_v23, %v1983_v19  ;;  %v1986_v25 = vpop.f32.mrb[14].mxu0  ;;  %2065 = vmatprep.mubr.bf16.mxu1 %v922_v20 }
 0x1ca   : > { %v1987_v27 = vpop.f32.mrb[15].mxu0  ;;  %2082 = vmatpush3.bf16.msra.mxu1 %v2291_v14  ;;  %v876_v14 = vld [vmem:[%s2963_s0 + $0x60] sm:$0xff] }
 0x1cb   : > { %v1988_v29 = vadd.f32 %v1987_v27, %v1986_v25  ;;  %2083 = vmatprep.subr.bf16.mxu1 %v2292_v21  ;;  %v3019_v31 = vadd.f32 %v1985_v24, %v870_v26  ;;  %v910_v32 = vmul.f32 %v1985_v24, %v870_v26 }
 0x1cd   : > { %v3021_v33 = vadd.f32 %v1988_v29, %v871_v28  ;;  %v911_v34 = vmul.f32 %v1988_v29, %v871_v28 }
 0x1ce   : > { %2084 = vmatpush3.bf16.msra.mxu1 %v2292_v21 }
 0x1cf   : > { %v1989_v35 = vpop.f32.mrb[16].mxu0  ;;  %v923_v36 = vpack.c.bf16 %v911_v34, %v910_v32  ;;  %2085 = vmatprep.subr.bf16.mxu1 %v2293_v30  ;;  %v899_v38 = vpack.c.bf16 %v3021_v33, %v3019_v31  ;;  %v878_v32 = vld [vmem:[%s2963_s0 + $0x70] sm:$0xff] }
 0x1d0   : > { %v1990_v39 = vpop.f32.mrb[17].mxu0 }
 0x1d1   : > { %v1991_v40 = vadd.f32 %v1990_v39, %v1989_v35  ;;  %v1992_v41 = vpop.f32.mrb[18].mxu0  ;;  %2066 = vmatmul.mubr.bf16.gmra.mrb[4].mxu1 %v923_v36  ;;  %v879_v35 = vld [vmem:[%s2963_s0 + $0x78] sm:$0xff] }
 0x1d2   : > { %v1993_v43 = vpop.f32.mrb[19].mxu0  ;;  %2086 = vmatpush3.bf16.msra.mxu1 %v2293_v30 }
 0x1d3   : > { %v1994_v45 = vadd.f32 %v1993_v43, %v1992_v41  ;;  %2087 = vmatprep.subr.bf16.mxu1 %v2294_v37  ;;  %v888_v47 = vadd.f32 %v1991_v40, %v872_v42  ;;  %v912_v48 = vmul.f32 %v1991_v40, %v872_v42 }
 0x1d5   : > { %v889_v51 = vadd.f32 %v1994_v45, %v873_v44  ;;  %v913_v52 = vmul.f32 %v1994_v45, %v873_v44 }
 0x1d6   : > { %2088 = vmatpush3.bf16.msra.mxu1 %v2294_v37 }
 0x1d7   : > { %v1995_v53 = vpop.f32.mrb[20].mxu0  ;;  %v924_v54 = vpack.c.bf16 %v913_v52, %v912_v48  ;;  %2089 = vmatprep.subr.bf16.mxu1 %v2295_v46  ;;  %v900_v57 = vpack.c.bf16 %v889_v51, %v888_v47 }
 0x1d8   : > { %v1996_v58 = vpop.f32.mrb[21].mxu0 }
 0x1d9   : > { %v1997_v59 = vadd.f32 %v1996_v58, %v1995_v53  ;;  %v1998_v60 = vpop.f32.mrb[22].mxu0  ;;  %2069 = vmatprep.mubr.bf16.mxu1 %v924_v54 }
 0x1da   : > { %v1999_v62 = vpop.f32.mrb[23].mxu0  ;;  %2090 = vmatpush3.bf16.msra.mxu1 %v2295_v46 }
 0x1db   : > { %v2000_v2 = vadd.f32 %v1999_v62, %v1998_v60  ;;  %2091 = vmatprep.subr.bf16.mxu1 %v2296_v56  ;;  %v890_v4 = vadd.f32 %v1997_v59, %v874_v61  ;;  %v914_v5 = vmul.f32 %v1997_v59, %v874_v61 }
 0x1dd   : > { %v891_v6 = vadd.f32 %v2000_v2, %v875_v0  ;;  %v915_v7 = vmul.f32 %v2000_v2, %v875_v0 }
 0x1de   : > { %2092 = vmatpush3.bf16.msra.mxu1 %v2296_v56 }
 0x1df   : > { %v2001_v8 = vpop.f32.mrb[24].mxu0  ;;  %v925_v9 = vpack.c.bf16 %v915_v7, %v914_v5  ;;  %v901_v10 = vpack.c.bf16 %v891_v6, %v890_v4 }
 0x1e0   : > { %v2002_v11 = vpop.f32.mrb[25].mxu0 }
 0x1e1   : > { %v2003_v12 = vadd.f32 %v2002_v11, %v2001_v8  ;;  %v2004_v13 = vpop.f32.mrb[26].mxu0  ;;  %2070 = vmatmul.mubr.bf16.gmra.mrb[8].mxu1 %v925_v9 }
 0x1e2   : > { %v2005_v16 = vpop.f32.mrb[27].mxu0 }
 0x1e3   : > { %v2006_v19 = vadd.f32 %v2005_v16, %v2004_v13  ;;  %v892_v20 = vadd.f32 %v2003_v12, %v876_v14  ;;  %v916_v21 = vmul.f32 %v2003_v12, %v876_v14 }
 0x1e5   : > { %v893_v23 = vadd.f32 %v2006_v19, %v877_v18  ;;  %v917_v24 = vmul.f32 %v2006_v19, %v877_v18 }
 0x1e7   : > { %v2007_v25 = vpop.f32.mrb[28].mxu0  ;;  %v926_v26 = vpack.c.bf16 %v917_v24, %v916_v21  ;;  %v902_v27 = vpack.c.bf16 %v893_v23, %v892_v20 }
 0x1e8   : > { %v2008_v28 = vpop.f32.mrb[29].mxu0 }
 0x1e9   : > { %v2009_v29 = vadd.f32 %v2008_v28, %v2007_v25  ;;  %v2010_v30 = vpop.f32.mrb[30].mxu0  ;;  %2073 = vmatprep.mubr.bf16.mxu1 %v926_v26 }
 0x1ea   : > { %v2011_v34 = vpop.f32.mrb[31].mxu0 }
 0x1eb   : > { %v2012_v36 = vadd.f32 %v2011_v34, %v2010_v30  ;;  %v894_v37 = vadd.f32 %v2009_v29, %v878_v32  ;;  %v918_v39 = vmul.f32 %v2009_v29, %v878_v32 }
 0x1ed   : > { %v895_v40 = vadd.f32 %v2012_v36, %v879_v35  ;;  %v919_v41 = vmul.f32 %v2012_v36, %v879_v35 }
 0x1ef   : > { %v927_v42 = vpack.c.bf16 %v919_v41, %v918_v39  ;;  %v903_v43 = vpack.c.bf16 %v895_v40, %v894_v37 }
 0x1f1   : > { %2074 = vmatmul.mubr.bf16.gmra.mrb[12].mxu1 %v927_v42 }
 0x1f2   : > { %2093 = vmatprep.mubr.bf16.mxu1 %v896_v55 }
 0x1f9   : > { %2094 = vmatmul.mubr.bf16.vlgmr.msra.gmra.mrb[0].mxu1 %v897_v3 }
 0x1fa   : > { %2097 = vmatprep.mubr.bf16.mxu1 %v898_v22 }
 0x201   : > { %2098 = vmatmul.mubr.bf16.gmra.mrb[4].mxu1 %v899_v38 }
 0x202   : > { %2101 = vmatprep.mubr.bf16.mxu1 %v900_v57 }
 0x209   : > { %2102 = vmatmul.mubr.bf16.gmra.mrb[8].mxu1 %v901_v10 }
 0x20a   : > { %2105 = vmatprep.mubr.bf16.mxu1 %v902_v27 }
 0x211   : > { %2106 = vmatmul.mubr.bf16.gmra.mrb[12].mxu1 %v903_v43 }
 0x2cc   : > { %v2095_v50 = vpop.f32.mrb[0].mxu1 }
 0x2cd   : > { %v1259_v55 = vadd.f32 %v2095_v50, %v3048_v49  ;;  %v1187_v63 = vpop.f32.mrb[1].mxu1 }
 0x2ce   : > { %v1257_v1 = vadd.f32 %v3048_v49, %v1187_v63  ;;  %v2096_v3 = vpop.f32.mrb[2].mxu1 }
 0x2cf   : > { %vm1275_vm0 = vcmp.ge.f32.partialorder %v1259_v55, 0.0  ;;  %v1291_v15 = vmul.f32 0.2, %v1259_v55  ;;  %v1260_v17 = vadd.f32 %v2096_v3, %v3048_v49  ;;  %v1190_v22 = vpop.f32.mrb[3].mxu1 }
 0x2d0   : > { %vm1273_vm1 = vcmp.ge.f32.partialorder %v1257_v1, 0.0  ;;  %v1289_v31 = vmul.f32 0.2, %v1257_v1  ;;  %v1258_v33 = vadd.f32 %v3048_v49, %v1190_v22 }
 0x2d1   : > { %vm1276_vm2 = vcmp.ge.f32.partialorder %v1260_v17, 0.0  ;;  %v1292_v38 = vmul.f32 0.2, %v1260_v17  ;;  %v3055_v44 = vsel %vm1275_vm0, %v1259_v55, %v1291_v15 }
 0x2d2   : > { %vm1274_vm3 = vcmp.ge.f32.partialorder %v1258_v33, 0.0  ;;  %v1290_v45 = vmul.f32 0.2, %v1258_v33  ;;  %v1323_v46 = vmul.f32 %v3055_v44, %v3055_v44  ;;  %1419 = vst [vmem:[%s3060_s22 + $0x10] sm:$0xff] %v3055_v44  ;;  %v3064_v47 = vsel %vm1273_vm1, %v1257_v1, %v1289_v31 }
 0x2d3   : > { %v3066_v48 = vsel %vm1276_vm2, %v1260_v17, %v1292_v38  ;;  %v1321_v51 = vmul.f32 %v3064_v47, %v3064_v47  ;;  %1417 = vst [vmem:[%s3060_s22] sm:$0xff] %v3064_v47 }
 0x2d4   : > { %1420 = vst [vmem:[%s3060_s22 + $0x18] sm:$0xff] %v3066_v48  ;;  %v3074_v52 = vsel %vm1274_vm3, %v1258_v33, %v1290_v45  ;;  %1341 = vadd.xlane.f32.xlu1 %v1323_v46  ;;  %v1910_v53 = vpack.c.bf16 %v3066_v48, %v3055_v44  ;;  %v2099_v54 = vpop.f32.mrb[4].mxu1  ;;  %v1324_v61 = vmul.f32 %v3066_v48, %v3066_v48 }
 0x2d5   : > { %1418 = vst [vmem:[%s3060_s22 + $0x8] sm:$0xff] %v3074_v52  ;;  %v1263_v56 = vadd.f32 %v2099_v54, %v3048_v49  ;;  %1337 = vadd.xlane.f32.xlu0 %v1321_v51  ;;  %v1905_v57 = vpack.c.bf16 %v3074_v52, %v3064_v47  ;;  %v1203_v58 = vpop.f32.mrb[5].mxu1  ;;  %v1322_v4 = vmul.f32 %v3074_v52, %v3074_v52 }
 0x2d6   : > { %1942 = vst [vmem:[%s3083_s1 + $0x8] sm:$0xff] %v1910_v53   ;;  %v1261_v59 = vadd.f32 %v3048_v49, %v1203_v58  ;;  %v2100_v60 = vpop.f32.mrb[6].mxu1 }
 0x2d7   : > { %vm1279_vm4 = vcmp.ge.f32.partialorder %v1263_v56, 0.0  ;;  %v1295_v62 = vmul.f32 0.2, %v1263_v56  ;;  %1906 = vst [vmem:[%s3083_s1] sm:$0xff] %v1905_v57   ;;  %v1264_v0 = vadd.f32 %v2100_v60, %v3048_v49  ;;  %v1206_v2 = vpop.f32.mrb[7].mxu1 }
 0x2d8   : > { %vm1277_vm5 = vcmp.ge.f32.partialorder %v1261_v59, 0.0  ;;  %v1293_v5 = vmul.f32 0.2, %v1261_v59  ;;  %v1262_v6 = vadd.f32 %v3048_v49, %v1206_v2  ;;  %1343 = vadd.xlane.f32.xlu1 %v1324_v61 }
 0x2d9   : > { %v3094_v7 = vsel %vm1279_vm4, %v1263_v56, %v1295_v62  ;;  %vm1280_vm6 = vcmp.ge.f32.partialorder %v1264_v0, 0.0  ;;  %v1296_v8 = vmul.f32 0.2, %v1264_v0  ;;  %1339 = vadd.xlane.f32.xlu0 %v1322_v4 }
 0x2da   : > { %1423 = vst [vmem:[%s3060_s22 + $0x30] sm:$0xff] %v3094_v7  ;;  %v3098_v9 = vsel %vm1277_vm5, %v1261_v59, %v1293_v5  ;;  %vm1278_vm7 = vcmp.ge.f32.partialorder %v1262_v6, 0.0  ;;  %v1294_v10 = vmul.f32 0.2, %v1262_v6  ;;  %v1327_v11 = vmul.f32 %v3094_v7, %v3094_v7 }
 0x2db   : > { %1421 = vst [vmem:[%s3060_s22 + $0x20] sm:$0xff] %v3098_v9  ;;  %v3104_v12 = vsel %vm1280_vm6, %v1264_v0, %v1296_v8  ;;  %v1325_v28 = vmul.f32 %v3098_v9, %v3098_v9 }
 0x2dc   : > { %1424 = vst [vmem:[%s3060_s22 + $0x38] sm:$0xff] %v3104_v12  ;;  %v1920_v13 = vpack.c.bf16 %v3104_v12, %v3094_v7  ;;  %v3110_v14 = vsel %vm1278_vm7, %v1262_v6, %v1294_v10  ;;  %v2103_v16 = vpop.f32.mrb[8].mxu1  ;;  %v1328_v18 = vmul.f32 %v3104_v12, %v3104_v12 }
 0x2dd   : > { %1422 = vst [vmem:[%s3060_s22 + $0x28] sm:$0xff] %v3110_v14  ;;  %v1915_v19 = vpack.c.bf16 %v3110_v14, %v3098_v9  ;;  %v1267_v20 = vadd.f32 %v2103_v16, %v3048_v49  ;;  %1349 = vadd.xlane.f32.xlu0 %v1327_v11  ;;  %v1219_v21 = vpop.f32.mrb[9].mxu1  ;;  %v1326_v32 = vmul.f32 %v3110_v14, %v3110_v14 }
 0x2de   : > { %1944 = vst [vmem:[%s3083_s1 + $0x18] sm:$0xff] %v1920_v13   ;;  %v1265_v23 = vadd.f32 %v3048_v49, %v1219_v21  ;;  %1351 = vadd.xlane.f32.xlu1 %v1328_v18  ;;  %v2104_v24 = vpop.f32.mrb[10].mxu1 }
 0x2df   : > { %1943 = vst [vmem:[%s3083_s1 + $0x10] sm:$0xff] %v1915_v19   ;;  %vm1283_vm8 = vcmp.ge.f32.partialorder %v1267_v20, 0.0  ;;  %v1299_v25 = vmul.f32 0.2, %v1267_v20  ;;  %v1268_v26 = vadd.f32 %v2104_v24, %v3048_v49  ;;  %v1222_v27 = vpop.f32.mrb[11].mxu1 }
 0x2e0   : > { %vm1281_vm9 = vcmp.ge.f32.partialorder %v1265_v23, 0.0  ;;  %v1297_v29 = vmul.f32 0.2, %v1265_v23  ;;  %v1266_v30 = vadd.f32 %v3048_v49, %v1222_v27 }
 0x2e1   : > { %v3128_v34 = vsel %vm1283_vm8, %v1267_v20, %v1299_v25  ;;  %vm1284_vm10 = vcmp.ge.f32.partialorder %v1268_v26, 0.0  ;;  %v1300_v35 = vmul.f32 0.2, %v1268_v26  ;;  %1345 = vadd.xlane.f32.xlu0 %v1325_v28 }
 0x2e2   : > { %1427 = vst [vmem:[%s3060_s22 + $0x50] sm:$0xff] %v3128_v34  ;;  %v3132_v36 = vsel %vm1281_vm9, %v1265_v23, %v1297_v29  ;;  %vm1282_vm11 = vcmp.ge.f32.partialorder %v1266_v30, 0.0  ;;  %v1298_v37 = vmul.f32 0.2, %v1266_v30  ;;  %1347 = vadd.xlane.f32.xlu1 %v1326_v32  ;;  %v1331_v39 = vmul.f32 %v3128_v34, %v3128_v34 }
 0x2e3   : > { %1425 = vst [vmem:[%s3060_s22 + $0x40] sm:$0xff] %v3132_v36  ;;  %v3138_v40 = vsel %vm1284_vm10, %v1268_v26, %v1300_v35  ;;  %v1329_v33 = vmul.f32 %v3132_v36, %v3132_v36 }
 0x2e4   : > { %1428 = vst [vmem:[%s3060_s22 + $0x58] sm:$0xff] %v3138_v40  ;;  %v1930_v41 = vpack.c.bf16 %v3138_v40, %v3128_v34  ;;  %v3144_v42 = vsel %vm1282_vm11, %v1266_v30, %v1298_v37  ;;  %v2107_v43 = vpop.f32.mrb[12].mxu1  ;;  %v1332_v50 = vmul.f32 %v3138_v40, %v3138_v40 }
 0x2e5   : > { %1426 = vst [vmem:[%s3060_s22 + $0x48] sm:$0xff] %v3144_v42  ;;  %v1925_v55 = vpack.c.bf16 %v3144_v42, %v3132_v36  ;;  %v1271_v63 = vadd.f32 %v2107_v43, %v3048_v49  ;;  %1357 = vadd.xlane.f32.xlu0 %v1331_v39  ;;  %v1235_v1 = vpop.f32.mrb[13].mxu1  ;;  %v1330_v46 = vmul.f32 %v3144_v42, %v3144_v42 }
 0x2e6   : > { %1946 = vst [vmem:[%s3083_s1 + $0x28] sm:$0xff] %v1930_v41   ;;  %v1269_v3 = vadd.f32 %v3048_v49, %v1235_v1  ;;  %1359 = vadd.xlane.f32.xlu1 %v1332_v50  ;;  %v2108_v15 = vpop.f32.mrb[14].mxu1 }
 0x2e7   : > { %1945 = vst [vmem:[%s3083_s1 + $0x20] sm:$0xff] %v1925_v55   ;;  %vm1287_vm12 = vcmp.ge.f32.partialorder %v1271_v63, 0.0  ;;  %v1303_v17 = vmul.f32 0.2, %v1271_v63  ;;  %v1272_v22 = vadd.f32 %v2108_v15, %v3048_v49  ;;  %v1238_v31 = vpop.f32.mrb[15].mxu1 }
 0x2e8   : > { %vm1285_vm13 = vcmp.ge.f32.partialorder %v1269_v3, 0.0  ;;  %v1301_v38 = vmul.f32 0.2, %v1269_v3  ;;  %v1270_v45 = vadd.f32 %v3048_v49, %v1238_v31 }
 0x2e9   : > { %v3162_v51 = vsel %vm1287_vm12, %v1271_v63, %v1303_v17  ;;  %vm1288_vm14 = vcmp.ge.f32.partialorder %v1272_v22, 0.0  ;;  %v1304_v53 = vmul.f32 0.2, %v1272_v22  ;;  %1353 = vadd.xlane.f32.xlu0 %v1329_v33 }
 0x2ea   : > { %1431 = vst [vmem:[%s3060_s22 + $0x70] sm:$0xff] %v3162_v51  ;;  %v3166_v54 = vsel %vm1285_vm13, %v1269_v3, %v1301_v38  ;;  %vm1286_vm15 = vcmp.ge.f32.partialorder %v1270_v45, 0.0  ;;  %v1302_v56 = vmul.f32 0.2, %v1270_v45  ;;  %1355 = vadd.xlane.f32.xlu1 %v1330_v46  ;;  %v1335_v62 = vmul.f32 %v3162_v51, %v3162_v51 }
 0x2eb   : > { %1429 = vst [vmem:[%s3060_s22 + $0x60] sm:$0xff] %v3166_v54  ;;  %v3170_v49 = vsel %vm1288_vm14, %v1272_v22, %v1304_v53  ;;  %v1333_v57 = vmul.f32 %v3166_v54, %v3166_v54 }
 0x2ec   : > { %1432 = vst [vmem:[%s3060_s22 + $0x78] sm:$0xff] %v3170_v49  ;;  %v1940_v58 = vpack.c.bf16 %v3170_v49, %v3162_v51  ;;  %v3178_v59 = vsel %vm1286_vm15, %v1270_v45, %v1302_v56  ;;  %v1336_v0 = vmul.f32 %v3170_v49, %v3170_v49 }
 0x2ed   : > { %1430 = vst [vmem:[%s3060_s22 + $0x68] sm:$0xff] %v3178_v59  ;;  %v1935_v60 = vpack.c.bf16 %v3178_v59, %v3166_v54  ;;  %1361 = vadd.xlane.f32.xlu0 %v1333_v57  ;;  %v1334_v61 = vmul.f32 %v3178_v59, %v3178_v59 }
 0x2ee   : > { %1948 = vst [vmem:[%s3083_s1 + $0x38] sm:$0xff] %v1940_v58  }
 0x2ef   : > { %1947 = vst [vmem:[%s3083_s1 + $0x30] sm:$0xff] %v1935_v60   ;;  %1363 = vadd.xlane.f32.xlu1 %v1334_v61 }
 0x2f1   : > { %1365 = vadd.xlane.f32.xlu0 %v1335_v62 }
 0x2f3   : > { %1367 = vadd.xlane.f32.xlu1 %v1336_v0 }
 0x2f4   : > { %2486 = shalt.err (!%p2483_p0)
}
 0x2f5   : > { %s2487_s11 = scalar_lea.hbm %s3197_s14, 1024  ;;  %s2491_s10 = scalar_lea.hbm %s3437_s16, 2048 }
 0x2f6   : > { %p2488_p7 = scmp.ne.s32.totalorder %s3197_s14, %s2487_s11  ;;  %p2492_p2 = scmp.lt.u32.totalorder %s3197_s14, %s3437_s16 }
 0x2f7   : > { %p2493_p11 = scmp.lt.u32.totalorder %s2491_s10, %s2487_s11  ;;  %p2495_p6 = scmp.lt.u32.totalorder %s2487_s11, %s3197_s14 }
 0x2f8   : > { %p2489_p5 = pnand %p2488_p7, %p3438_p13 }
 0x2f9   : > { %p2494_p4 = por %p2493_p11, %p2492_p2 }
 0x2fa   : > { %p2490_p9 = pneg %p2489_p5 }
 0x2fb   : > { %p2496_p10 = por %p2495_p6, %p2494_p4 }
 0x2fd   : > { %p2497_p1 = pnand %p2496_p10, %p2490_p9 }
 0x2ff   : > { %2500 = shalt.err (!%p2497_p1)
}
 0x300   : > { %s2643_s15 = smov 64   ;;  %s2644_s24 = smov 4  }
 0x301   : > { %2142 = dma.vmem_to_hbm [thread:$0]  (%p3438_p13), %s3199_s25, 1024, %s3197_s14, %s3203_s17, %s2643_s15, %s2643_s15, %s2644_s24  }
 0x302   : > { %s1899_s1 = sshll.u32 %s3435_s19, 11  ;;  %s1553_s7 = sshll.u32 %s3060_s22, 4  ;;  %s3236_s7 = int_to_ptr.vmem [resolvable:$true] %s1553_s7 }
 0x303   : > { %s3439_s6 = sld [smem:[#allocation33_spill]]  ;;  %s1530_s20 = scalar_lea.sflag [#allocation5], %s2944_s23 }
 0x304   : > { %s2501_s12 = scalar_lea.vmem %s3236_s7, 2048  ;;  %s2645_s25 = smov [#allocation12]  }
 0x305   : > { %p2502_p8 = scmp.ne.s32.totalorder %s3236_s7, %s2501_s12  ;;  %s2505_s14 = sshll.u32 %s2645_s25, 4  ;;  %s2506_s14 = int_to_ptr.vmem [resolvable:$false] %s2505_s14 }
 0x306   : > { %s2507_s22 = scalar_lea.vmem %s2506_s14, 4096  ;;  %p2508_p0 = scmp.lt.s32.totalorder %s3236_s7, %s2506_s14 }
 0x307   : > { %p2503_p12 = pnand %p2502_p8, %p3438_p13  ;;  %p2509_p7 = scmp.lt.s32.totalorder %s2507_s22, %s2501_s12 }
 0x309   : > { %s3234_s8 = scalar_lea.hbm %s3439_s6, %s1899_s1  ;;  %p2504_p3 = pneg %p2503_p12 }
 0x30a   : > { %p2510_p5 = por %p2509_p7, %p2508_p0 }
 0x30c   : > { %p2511_p9 = pnand %p2510_p5, %p2504_p3 }
 0x30e   : > { %2514 = shalt.err (!%p2511_p9)
}
 0x30f   : > { %s2515_s11 = scalar_lea.hbm %s3234_s8, 2048  ;;  %s2519_s10 = scalar_lea.hbm %s3439_s6, 4096 }
 0x310   : > { %p2516_p2 = scmp.ne.s32.totalorder %s3234_s8, %s2515_s11  ;;  %p2520_p6 = scmp.lt.u32.totalorder %s3234_s8, %s3439_s6 }
 0x311   : > { %p2521_p10 = scmp.lt.u32.totalorder %s2519_s10, %s2515_s11  ;;  %p2523_p8 = scmp.lt.u32.totalorder %s2515_s11, %s3234_s8 }
 0x312   : > { %p2517_p11 = pnand %p2516_p2, %p3438_p13 }
 0x313   : > { %p2522_p1 = por %p2521_p10, %p2520_p6 }
 0x314   : > { %p2518_p4 = pneg %p2517_p11 }
 0x315   : > { %p2524_p12 = por %p2523_p8, %p2522_p1 }
 0x317   : > { %p2525_p3 = pnand %p2524_p12, %p2518_p4 }
 0x319   : > { %2528 = shalt.err (!%p2525_p3)
}
 0x31a   : > { %s2646_s15 = smov 128   ;;  %s2647_s24 = smov 8  }
 0x31b   : > { %2141 = dma.vmem_to_hbm [thread:$0]  (%p3438_p13), %s3236_s7, 2048, %s3234_s8, %s1530_s20, %s2646_s15, %s2646_s15, %s2647_s24  }
 0x31c   : > { %s3268_s23 = scalar_lea.vmem [#allocation15], %s2947_s21  ;;  %s3440_s18 = sld [smem:[#allocation35_spill]] }
 0x31d   : > { %s1585_s21 = sshll.u32 %s3268_s23, 4  ;;  %s2648_s12 = smov [#allocation15]   ;;  %s3307_s21 = int_to_ptr.vmem [resolvable:$true] %s1585_s21 }
 0x31e   : > { %s2529_s20 = scalar_lea.vmem %s3307_s21, 2048  ;;  %s2533_s25 = sshll.u32 %s2648_s12, 4  ;;  %s2534_s25 = int_to_ptr.vmem [resolvable:$false] %s2533_s25 }
 0x31f   : > { %p2530_p0 = scmp.ne.s32.totalorder %s3307_s21, %s2529_s20  ;;  %s2535_s19 = scalar_lea.vmem %s2534_s25, 4096 }
 0x320   : > { %p2536_p9 = scmp.lt.s32.totalorder %s3307_s21, %s2534_s25  ;;  %p2537_p2 = scmp.lt.s32.totalorder %s2535_s19, %s2529_s20 }
 0x321   : > { %p2531_p7 = pnand %p2530_p0, %p3438_p13 }
 0x322   : > { %s3305_s8 = scalar_lea.hbm %s3440_s18, %s1899_s1  ;;  %p2538_p11 = por %p2537_p2, %p2536_p9 }
 0x323   : > { %p2532_p5 = pneg %p2531_p7 }
 0x325   : > { %p2539_p4 = pnand %p2538_p11, %p2532_p5 }
 0x361   : > { %v1342_v2 = vpop.xlane.xlu1 %1341 }
 0x362   : > { %v1371_v4 = vmax.f32 %v1342_v2, 1e-24  ;;  %v1338_v5 = vpop.xlane.xlu0 %1337 }
 0x363   : > { %v1369_v6 = vmax.f32 %v1338_v5, 1e-24 }
 0x364   : > { %2297 = vrsqrt.f32 %v1371_v4 }
 0x365   : > { %2299 = vrsqrt.f32 %v1369_v6  ;;  %v1344_v8 = vpop.xlane.xlu1 %1343 }
 0x366   : > { %v1372_v10 = vmax.f32 %v1344_v8, 1e-24  ;;  %v1340_v11 = vpop.xlane.xlu0 %1339 }
 0x367   : > { %v1370_v13 = vmax.f32 %v1340_v11, 1e-24 }
 0x368   : > { %2301 = vrsqrt.f32 %v1372_v10 }
 0x369   : > { %2303 = vrsqrt.f32 %v1370_v13 }
 0x36a   : > { %v1350_v16 = vpop.xlane.xlu0 %1349 }
 0x36b   : > { %v1375_v18 = vmax.f32 %v1350_v16, 1e-24  ;;  %v1352_v19 = vpop.xlane.xlu1 %1351 }
 0x36c   : > { %v1376_v20 = vmax.f32 %v1352_v19, 1e-24 }
 0x36d   : > { %2305 = vrsqrt.f32 %v1375_v18 }
 0x36e   : > { %v2298_v21 = vpop.eup %2297  ;;  %2307 = vrsqrt.f32 %v1376_v20  ;;  %v1346_v23 = vpop.xlane.xlu0 %1345 }
 0x36f   : > { %v2300_v24 = vpop.eup %2299  ;;  %v1403_v25 = vmul.f32 %v2298_v21, %v3055_v44  ;;  %v1373_v26 = vmax.f32 %v1346_v23, 1e-24  ;;  %v1348_v27 = vpop.xlane.xlu1 %1347 }
 0x370   : > { %v1401_v28 = vmul.f32 %v2300_v24, %v3064_v47  ;;  %v1374_v29 = vmax.f32 %v1348_v27, 1e-24 }
 0x371   : > { %1515 = vst [vmem:[%s3268_s23 + $0x10] sm:$0xff] %v1403_v25  ;;  %2309 = vrsqrt.f32 %v1373_v26 }
 0x372   : > { %v2302_v30 = vpop.eup %2301  ;;  %1513 = vst [vmem:[%s3268_s23] sm:$0xff] %v1401_v28  ;;  %2311 = vrsqrt.f32 %v1374_v29  ;;  %v1358_v32 = vpop.xlane.xlu0 %1357 }
 0x373   : > { %v2304_v35 = vpop.eup %2303  ;;  %v1404_v44 = vmul.f32 %v2302_v30, %v3066_v48  ;;  %v1379_v37 = vmax.f32 %v1358_v32, 1e-24  ;;  %v1360_v39 = vpop.xlane.xlu1 %1359 }
 0x374   : > { %v1402_v47 = vmul.f32 %v2304_v35, %v3074_v52  ;;  %v1380_v41 = vmax.f32 %v1360_v39, 1e-24 }
 0x375   : > { %1516 = vst [vmem:[%s3268_s23 + $0x18] sm:$0xff] %v1404_v44  ;;  %2313 = vrsqrt.f32 %v1379_v37 }
 0x376   : > { %1514 = vst [vmem:[%s3268_s23 + $0x8] sm:$0xff] %v1402_v47  ;;  %2315 = vrsqrt.f32 %v1380_v41  ;;  %v1354_v43 = vpop.xlane.xlu0 %1353 }
 0x377   : > { %v2306_v50 = vpop.eup %2305  ;;  %v1377_v55 = vmax.f32 %v1354_v43, 1e-24  ;;  %v1356_v63 = vpop.xlane.xlu1 %1355 }
 0x378   : > { %v2308_v1 = vpop.eup %2307  ;;  %v1407_v3 = vmul.f32 %v2306_v50, %v3094_v7  ;;  %v1378_v48 = vmax.f32 %v1356_v63, 1e-24 }
 0x379   : > { %v1408_v15 = vmul.f32 %v2308_v1, %v3104_v12  ;;  %2317 = vrsqrt.f32 %v1377_v55 }
 0x37a   : > { %1519 = vst [vmem:[%s3268_s23 + $0x30] sm:$0xff] %v1407_v3  ;;  %2319 = vrsqrt.f32 %v1378_v48  ;;  %v1362_v52 = vpop.xlane.xlu0 %1361 }
 0x37b   : > { %v2310_v17 = vpop.eup %2309  ;;  %1520 = vst [vmem:[%s3268_s23 + $0x38] sm:$0xff] %v1408_v15  ;;  %v1381_v22 = vmax.f32 %v1362_v52, 1e-24 }
 0x37c   : > { %v2312_v31 = vpop.eup %2311  ;;  %v1405_v33 = vmul.f32 %v2310_v17, %v3098_v9  ;;  %v1364_v38 = vpop.xlane.xlu1 %1363 }
 0x37d   : > { %v1406_v45 = vmul.f32 %v2312_v31, %v3110_v14  ;;  %2321 = vrsqrt.f32 %v1381_v22  ;;  %v1382_v7 = vmax.f32 %v1364_v38, 1e-24 }
 0x37e   : > { %1517 = vst [vmem:[%s3268_s23 + $0x20] sm:$0xff] %v1405_v33  ;;  %v1366_v12 = vpop.xlane.xlu0 %1365 }
 0x37f   : > { %v2314_v46 = vpop.eup %2313  ;;  %1518 = vst [vmem:[%s3268_s23 + $0x28] sm:$0xff] %v1406_v45  ;;  %2323 = vrsqrt.f32 %v1382_v7  ;;  %v1383_v53 = vmax.f32 %v1366_v12, 1e-24 }
 0x380   : > { %v2316_v56 = vpop.eup %2315  ;;  %v1411_v57 = vmul.f32 %v2314_v46, %v3128_v34  ;;  %v1368_v58 = vpop.xlane.xlu1 %1367 }
 0x381   : > { %v1412_v9 = vmul.f32 %v2316_v56, %v3138_v40  ;;  %2325 = vrsqrt.f32 %v1383_v53  ;;  %v1384_v14 = vmax.f32 %v1368_v58, 1e-24 }
 0x382   : > { %1523 = vst [vmem:[%s3268_s23 + $0x50] sm:$0xff] %v1411_v57 }
 0x383   : > { %v2318_v60 = vpop.eup %2317  ;;  %1524 = vst [vmem:[%s3268_s23 + $0x58] sm:$0xff] %v1412_v9  ;;  %2327 = vrsqrt.f32 %v1384_v14 }
 0x384   : > { %v2320_v61 = vpop.eup %2319  ;;  %v1409_v62 = vmul.f32 %v2318_v60, %v3132_v36 }
 0x385   : > { %v1410_v0 = vmul.f32 %v2320_v61, %v3144_v42 }
 0x386   : > { %1521 = vst [vmem:[%s3268_s23 + $0x40] sm:$0xff] %v1409_v62 }
 0x387   : > { %v2322_v34 = vpop.eup %2321  ;;  %1522 = vst [vmem:[%s3268_s23 + $0x48] sm:$0xff] %v1410_v0 }
 0x388   : > { %v1413_v40 = vmul.f32 %v2322_v34, %v3166_v54 }
 0x389   : > { %v2324_v2 = vpop.eup %2323 }
 0x38a   : > { %1525 = vst [vmem:[%s3268_s23 + $0x60] sm:$0xff] %v1413_v40  ;;  %v1414_v4 = vmul.f32 %v2324_v2, %v3178_v59 }
 0x38b   : > { %v2326_v5 = vpop.eup %2325 }
 0x38c   : > { %1526 = vst [vmem:[%s3268_s23 + $0x68] sm:$0xff] %v1414_v4  ;;  %v1415_v6 = vmul.f32 %v2326_v5, %v3162_v51 }
 0x38d   : > { %v2328_v36 = vpop.eup %2327 }
 0x38e   : > { %1527 = vst [vmem:[%s3268_s23 + $0x70] sm:$0xff] %v1415_v6  ;;  %v1416_v42 = vmul.f32 %v2328_v36, %v3170_v49 }
 0x390   : > { %1528 = vst [vmem:[%s3268_s23 + $0x78] sm:$0xff] %v1416_v42 }
 0x391   : > { %2542 = shalt.err (!%p2539_p4)
}
 0x392   : > { %s2543_s1 = scalar_lea.hbm %s3305_s8, 2048  ;;  %s2547_s11 = scalar_lea.hbm %s3440_s18, 4096 }
 0x393   : > { %p2544_p6 = scmp.ne.s32.totalorder %s3305_s8, %s2543_s1  ;;  %p2548_p8 = scmp.lt.u32.totalorder %s3305_s8, %s3440_s18 }
 0x394   : > { %p2549_p12 = scmp.lt.u32.totalorder %s2547_s11, %s2543_s1  ;;  %p2551_p0 = scmp.lt.u32.totalorder %s2543_s1, %s3305_s8 }
 0x395   : > { %p2545_p10 = pnand %p2544_p6, %p3438_p13 }
 0x396   : > { %p2550_p3 = por %p2549_p12, %p2548_p8 }
 0x397   : > { %p2546_p1 = pneg %p2545_p10 }
 0x398   : > { %p2552_p7 = por %p2551_p0, %p2550_p3 }
 0x39a   : > { %p2553_p5 = pnand %p2552_p7, %p2546_p1 }
 0x39c   : > { %2556 = shalt.err (!%p2553_p5)
}
 0x39d   : > { %2143 = dma.vmem_to_hbm [thread:$0]  (%p3438_p13), %s3307_s21, 2048, %s3305_s8, %s3203_s17, %s2646_s15, %s2646_s15, %s2647_s24  }
 0x39e PF: > { %s3441_s10 = sld [smem:[#allocation23_spill]]  ;;  %s3442_s0 = sld [smem:[#allocation27_spill]] }
 0x39f   : > { %s3443_s13 = sld [smem:[#allocation26_spill]] }
 0x3a4   : > { %s1600_s23 = sand.u32 1, %s3441_s10   ;;  %p3444_p9 = scmp.ne.s32.totalorder %s3442_s0, 0 }
 0x3a5   : > { %p3445_p2 = scmp.ge.s32.totalorder %s3443_s13, 2  ;;  %s1601_s7 = scalar_lea.sflag [#allocation5], %s1600_s23 }
 0x3a7   : > { %p2165_p11 = pnand %p3445_p2, %p3444_p9 }
 0x3a9   : > { %2602 = dma.done.wait (!%p2165_p11), %s1601_s7, 2048  }
 0x3aa   : > { %2604 = vsyncadd (!%p2165_p11), %s1601_s7, 4294965248  ;;  %s3446_s29 = sadd.s32 4294967294, %s3443_s13  }
 0x3ab   : > { %s1609_s30 = sand.u32 1, %s3446_s29  }
 0x3ac   : > { %s1610_s20 = scalar_lea.sflag [#allocation14], %s1609_s30 }
 0x3ad   : > { %2606 = dma.done.wait (!%p2165_p11), %s1610_s20, 3072  }
 0x3ae   : > { %2608 = vsyncadd (!%p2165_p11), %s1610_s20, 4294964224  ;;  %s30_s10 = sadd.s32 1, %s3443_s13   ;;  %s3447_s17 = sld [smem:[#allocation24_spill]] }
 0x3af   : > { %p27_p13 = scmp.ge.s32.totalorder %s30_s10, 4   ;;  %s3448_s29 = sld [smem:[#allocation30_spill]] }
 0x3b0   : > { %s3449_s15 = sld [smem:[#allocation28_spill]]  ;;  %s3450_s27 = smov %s2615_s28 }
 0x3b1   : > { %s3452_s30 = smov %s2627_s9  ;;  %29 = sbr.rel (!%p27_p13) target bundleno = 16 (0x10), region = 157 }
 0x3b4   : > { %s3451_s28 = smov %s3447_s17 }
 0x3b6   : > { %s3453_s9 = smov %s3449_s15 }
 0x3b8   :  { %1624 = vsyncpa [#allocation4], 1 }
 0x3b9   :  { %1626 = vsyncpa [#allocation4 + $0x1], 1 }
 0x3ba   :  { %1627 = vsyncpa [#allocation7], 1 }
 0x3bb   :  { %1628 = vsyncpa [#allocation11], 1 }
 0x3bc   :  { %1629 = vsyncpa [#allocation5], 1 }
 0x3bd   :  { %1631 = vsyncpa [#allocation5 + $0x1], 1 }
 0x3be   :  { %1632 = vsyncpa [#allocation14], 1 }
 0x3bf   :  { %1634 = vsyncpa [#allocation14 + $0x1], 1 }

</bundles_post_ra>
